<compile_context>
chip_gen: v7x
topology: tpu7x:2x2x1
jax: 0.10.0
libtpu: 0.0.40
codegen_flags: <defaults>
</compile_context>

<pallas_src>
import functools

import jax
import jax.numpy as jnp
from jax.experimental import pallas as pl
from jax.experimental.pallas import tpu as pltpu


# ---------------------------------------------------------------------------
# JAX glue: normalize_coordinate + F.grid_sample(bilinear, border, align_corners)
# ---------------------------------------------------------------------------
def normalize_coordinate(p, padding=0.1, plane="xz"):
    if plane == "xz":
        xy = p[..., jnp.array([0, 2])]
    elif plane == "xy":
        xy = p[..., jnp.array([0, 1])]
    else:  # 'yz'
        xy = p[..., jnp.array([1, 2])]
    xy = xy / (1.0 + padding + 10e-6) + 0.5
    # elementwise-equivalent to the conditional outlier clamps in the reference
    xy = jnp.clip(xy, 0.0, 1.0 - 10e-6)
    return xy


def grid_sample_bilinear_border(c, gx, gy):
    """c: (B, C, H, W); gx, gy: (B, T) in [-1, 1].  Returns (B, T, C)."""
    B, C, H, W = c.shape
    ix = (gx + 1.0) * 0.5 * (W - 1)   # align_corners=True
    iy = (gy + 1.0) * 0.5 * (H - 1)
    ix = jnp.clip(ix, 0.0, W - 1)     # padding_mode='border'
    iy = jnp.clip(iy, 0.0, H - 1)
    x0 = jnp.floor(ix)
    y0 = jnp.floor(iy)
    wx = ix - x0
    wy = iy - y0
    x0i = jnp.clip(x0, 0, W - 1).astype(jnp.int32)
    x1i = jnp.clip(x0 + 1, 0, W - 1).astype(jnp.int32)
    y0i = jnp.clip(y0, 0, H - 1).astype(jnp.int32)
    y1i = jnp.clip(y0 + 1, 0, H - 1).astype(jnp.int32)

    def gather(yy, xx):
        # per-batch advanced indexing: (C, H, W)[:, (T,), (T,)] -> (C, T) -> (T, C)
        return jax.vmap(lambda cb, yb, xb: cb[:, yb, xb].T)(c, yy, xx)

    v00 = gather(y0i, x0i)
    v01 = gather(y0i, x1i)
    v10 = gather(y1i, x0i)
    v11 = gather(y1i, x1i)
    wx = wx[..., None]
    wy = wy[..., None]
    return (v00 * (1 - wx) * (1 - wy) + v01 * wx * (1 - wy)
            + v10 * (1 - wx) * wy + v11 * wx * wy)


def sample_plane_feature(p, c_plane, plane, padding):
    xy = normalize_coordinate(p, padding=padding, plane=plane)
    vgrid = 2.0 * xy - 1.0
    # grid[...,0] -> W axis, grid[...,1] -> H axis (PyTorch grid_sample convention)
    return grid_sample_bilinear_border(c_plane, vgrid[..., 0], vgrid[..., 1])


# ---------------------------------------------------------------------------
# Pallas kernel: fused LocalDecoder MLP stack (transposed, lane-dense layout)
# ---------------------------------------------------------------------------
def _decoder_mlp_kernel(n_blocks, hidden, compute_dtype,
                        x_ref,                # (1, F_pad, tm)  f32, points on lanes
                        win_ref,              # (nb, H, F_pad)  compute_dtype, bias folded
                        w0_ref, b0_ref,       # (nb, H, H) compute_dtype, (nb, H, 1) f32
                        w1_ref, b1_ref,       # (nb, H, H) compute_dtype, (nb, H, 1) f32
                        wout_ref, bout_ref,   # (H, 1) f32, (1, 1) f32
                        out_ref):             # (1, tm)
    compute_dtype = jnp.dtype(compute_dtype)
    narrow = compute_dtype != jnp.dtype(jnp.float32)

    x = x_ref[0]                                            # (F_pad, tm) lane-dense f32
    xc = x.astype(compute_dtype) if narrow else x           # cast activation tile once

    def mm(w, a):
        # weights arrive pre-cast to compute_dtype; cast only the activation operand,
        # accumulate in f32 on the MXU, keep all element-wise math in f32.
        if narrow:
            a = a.astype(compute_dtype)
        return jnp.dot(w, a, preferred_element_type=jnp.float32)

    # Block 0 first layer: fc_p(p) + fc_c[0](c) + (bp + bc[0]) via the ones feature row.
    net = jnp.dot(win_ref[0], xc, preferred_element_type=jnp.float32)   # (H, tm)

    for i in range(n_blocks):
        if i > 0:
            # Lazy per-block fc_c contribution: nothing (nb*H, tm)-sized stays live.
            net = net + jnp.dot(win_ref[i], xc, preferred_element_type=jnp.float32)
        # ResnetBlockFC: dx = fc_1(relu(fc_0(relu(net)))); net = net + dx
        h = mm(w0_ref[i], jax.nn.relu(net)) + b0_ref[i]                 # (H, tm)
        dx = mm(w1_ref[i], jax.nn.relu(h)) + b1_ref[i]                  # (H, tm)
        net = net + dx

    # fc_out as VPU multiply + sublane reduce -> lane-dense (1, tm) output row.
    out_ref[...] = (jnp.sum(jax.nn.relu(net) * wout_ref[...],
                            axis=0, keepdims=True) + bout_ref[...])


def decoder_mlp_pallas(xT, fused, n_blocks, hidden, tile_m,
                       compute_dtype=jnp.float32,
                       vmem_limit_bytes=48 * 1024 * 1024):
    num_tiles, f_pad, tm = xT.shape
    assert tm == tile_m
    Npad = num_tiles * tile_m

    kernel = functools.partial(_decoder_mlp_kernel, n_blocks, hidden, compute_dtype)

    # Cost estimate reflecting real FLOPs / bytes (helps XLA schedule surrounding ops).
    flops = 2 * Npad * hidden * (n_blocks * f_pad + 2 * n_blocks * hidden + 1)
    bytes_accessed = int(xT.size * xT.dtype.itemsize + Npad * 4 +
                         sum(int(v.size) * v.dtype.itemsize for v in fused.values()))
    cost = pl.CostEstimate(flops=int(flops), transcendentals=0,
                           bytes_accessed=bytes_accessed)

    args = (xT, fused["w_in"], fused["w0T"], fused["b0c"],
            fused["w1T"], fused["b1c"], fused["wout"], fused["bout"])

    def build(weight_buffers):
        if weight_buffers is None:
            inv = lambda shape: pl.BlockSpec(shape, lambda i: (0,) * len(shape))
        else:
            # Grid-invariant weights/biases: single pipeline buffer saves VMEM
            # (meaningful headroom at hidden=256 / n_blocks=5 on v7x's 64 MiB).
            inv = lambda shape: pl.BlockSpec(shape, lambda i: (0,) * len(shape),
                                             pipeline_mode=pl.Buffered(weight_buffers))
        grid_spec = pltpu.PrefetchScalarGridSpec(
            num_scalar_prefetch=0,
            grid=(num_tiles,),
            in_specs=[
                # One contiguous HBM slab per grid step, points on the lane axis.
                pl.BlockSpec((1, f_pad, tile_m), lambda i: (i, 0, 0)),
                inv((n_blocks, hidden, f_pad)),     # fused fc_p/fc_c weights (+bias col)
                inv((n_blocks, hidden, hidden)),    # fc_0 weights (transposed)
                inv((n_blocks, hidden, 1)),         # fc_0 biases
                inv((n_blocks, hidden, hidden)),    # fc_1 weights (transposed)
                inv((n_blocks, hidden, 1)),         # fc_1 biases
                inv((hidden, 1)),                   # fc_out weight (column)
                inv((1, 1)),                        # fc_out bias
            ],
            out_specs=pl.BlockSpec((1, tile_m), lambda i: (0, i)),   # lane-dense logits
        )
        return pl.pallas_call(
            kernel,
            out_shape=jax.ShapeDtypeStruct((1, Npad), jnp.float32),
            grid_spec=grid_spec,
            compiler_params=pltpu.CompilerParams(
                dimension_semantics=("parallel",),
                vmem_limit_bytes=vmem_limit_bytes),
            cost_estimate=cost,
        )

    try:
        return build(1)(*args)
    except Exception:
        # TODO(synk): fallback for jax builds that reject pl.Buffered(1) as a
        # pipeline_mode; default double-buffering is functionally identical.
        return build(None)(*args)


# ---------------------------------------------------------------------------
# Wrapper-side parameter fusion / transposition (done ONCE, outside the forward)
# ---------------------------------------------------------------------------
def prepare_fused_params(params, n_blocks, dim, compute_dtype=jnp.float32):
    hidden = params["wp"].shape[1]
    c_dim = params["wc"].shape[1]
    f_raw = dim + c_dim + 1                       # +1: constant-ones row (folded bias)
    f_pad = ((f_raw + 7) // 8) * 8                # sublane-aligned contraction dim

    blocks = []
    for i in range(n_blocks):
        wp_part = params["wp"].T if i == 0 else jnp.zeros((hidden, dim), jnp.float32)
        bias = params["bc"][i] + (params["bp"] if i == 0 else 0.0)    # (1, hidden)
        blk = jnp.concatenate(
            [wp_part,                                     # cols [0, dim)
             params["wc"][i].T,                           # cols [dim, dim+c_dim)
             bias.T,                                      # col dim+c_dim (ones row)
             jnp.zeros((hidden, f_pad - f_raw), jnp.float32)],   # zero pad
            axis=1)                                       # (hidden, f_pad)
        blocks.append(blk)
    w_in = jnp.stack(blocks, axis=0)                      # (nb, H, F_pad)

    return {
        "w_in": w_in.astype(compute_dtype),
        "w0T": jnp.transpose(params["w0"], (0, 2, 1)).astype(compute_dtype),
        "b0c": jnp.transpose(params["b0"], (0, 2, 1)),    # (nb, H, 1) f32
        "w1T": jnp.transpose(params["w1"], (0, 2, 1)).astype(compute_dtype),
        "b1c": jnp.transpose(params["b1"], (0, 2, 1)),    # (nb, H, 1) f32
        "wout": params["wout"].astype(jnp.float32),       # (H, 1)
        "bout": params["bout"].astype(jnp.float32),       # (1, 1)
    }


# ---------------------------------------------------------------------------
# LocalDecoder forward (glue + kernel).  Returns Bernoulli logits (B, T).
# ---------------------------------------------------------------------------
def local_decoder_forward(p, c_planes, fused, n_blocks, padding=0.1,
                          tile_m_max=512, compute_dtype=jnp.float32,
                          vmem_limit_bytes=48 * 1024 * 1024):
    # NOTE: at production shapes (hidden=256, n_blocks=5, c_dim=128, T ~ tens of
    # thousands) raise tile_m_max to 2048-4096 (v5e/v6e) / 1024-2048 (v7x) and set
    # vmem_limit_bytes per generation (~96-100 MiB v5e/v6e, ~48-56 MiB v7x).
    B, T, dim = p.shape
    c = 0.0
    # TODO(synk): the 'grid' (3-D volume) sampling branch is not implemented, and the
    # bilinear plane gather stays in plain JAX (a Pallas scalar-prefetch DMA gather
    # would be needed to overlap it with the decoder at large T).
    for plane in ("xz", "xy", "yz"):
        if plane in c_planes:
            c = c + sample_plane_feature(p, c_planes[plane], plane, padding)
    c_dim = c.shape[-1]

    hidden = fused["w0T"].shape[-1]
    f_pad = fused["w_in"].shape[-1]
    N = B * T

    # Big tiles amortize per-step overhead, capped at the padded point count.
    tile_m = min(tile_m_max, max(128, ((N + 127) // 128) * 128))
    # Even tile count (>= 2) so dimension_semantics=("parallel",) can use both v7x TCs.
    Npad = ((N + 2 * tile_m - 1) // (2 * tile_m)) * (2 * tile_m)
    num_tiles = Npad // tile_m

    # Point coords + sampled features + constant-ones column (folded first-layer bias),
    # padded to the sublane-aligned feature width and to Npad points.  Inputs stay f32;
    # any bf16 narrowing happens on the matmul operands inside the kernel only.
    x = jnp.concatenate([p.reshape(N, dim).astype(jnp.float32),
                         c.reshape(N, c_dim).astype(jnp.float32),
                         jnp.ones((N, 1), jnp.float32)], axis=-1)
    x = jnp.pad(x, ((0, Npad - N), (0, f_pad - x.shape[-1])))
    # (num_tiles, F_pad, tile_m): one contiguous HBM slab per grid step, lane-dense.
    xT = jnp.transpose(x.reshape(num_tiles, tile_m, f_pad), (0, 2, 1))

    out = decoder_mlp_pallas(xT, fused, n_blocks, hidden, tile_m,
                             compute_dtype, vmem_limit_bytes)
    return out[0, :N].reshape(B, T)


# Pure-JAX reference for the MLP stack (original row layout, for correctness check).
def decoder_mlp_ref(p_flat, c_flat, params, n_blocks):
    net = p_flat @ params["wp"] + params["bp"]
    for i in range(n_blocks):
        net = net + c_flat @ params["wc"][i] + params["bc"][i]
        h = jax.nn.relu(net) @ params["w0"][i] + params["b0"][i]
        dx = jax.nn.relu(h) @ params["w1"][i] + params["b1"][i]
        net = net + dx
    return jax.nn.relu(net) @ params["wout"] + params["bout"]


# ---------------------------------------------------------------------------
# Main
# ---------------------------------------------------------------------------
if __name__ == "__main__":
    # Small, module-consistent shapes.
    B, T = 2, 64          # batch, query points
    dim = 3               # input point dimension
    c_dim = 32            # latent plane feature channels
    hidden = 32           # hidden size
    n_blocks = 3          # number of ResnetBlockFC blocks
    res = 16              # plane resolution
    padding = 0.1

    key = jax.random.PRNGKey(0)
    keys = jax.random.split(key, 16)

    def init_w(k, shape, fan_in):
        return (jax.random.uniform(k, shape, jnp.float32, -1.0, 1.0)
                / jnp.sqrt(jnp.float32(fan_in)))

    params = {
        "wp":   init_w(keys[0], (dim, hidden), dim),
        "bp":   init_w(keys[1], (1, hidden), dim),
        "wc":   init_w(keys[2], (n_blocks, c_dim, hidden), c_dim),
        "bc":   init_w(keys[3], (n_blocks, 1, hidden), c_dim),
        "w0":   init_w(keys[4], (n_blocks, hidden, hidden), hidden),
        "b0":   init_w(keys[5], (n_blocks, 1, hidden), hidden),
        "w1":   init_w(keys[6], (n_blocks, hidden, hidden), hidden),
        "b1":   init_w(keys[7], (n_blocks, 1, hidden), hidden),
        "wout": init_w(keys[8], (hidden, 1), hidden),
        "bout": init_w(keys[9], (1, 1), hidden),
    }

    # Query points roughly in the unit cube [-0.5, 0.5]^3.
    p = jax.random.uniform(keys[10], (B, T, dim), jnp.float32, -0.5, 0.5)
    c_planes = {
        "xz": jax.random.normal(keys[11], (B, c_dim, res, res), jnp.float32),
        "xy": jax.random.normal(keys[12], (B, c_dim, res, res), jnp.float32),
        "yz": jax.random.normal(keys[13], (B, c_dim, res, res), jnp.float32),
    }

    # Parameter fusion is hoisted out of the forward (done once, re-used per call).
    # f32 MXU operands keep the exact check; pass compute_dtype=jnp.bfloat16 here for
    # throughput on v5e/v6e/v7x (then loosen the tolerance to ~1e-2).
    fused = prepare_fused_params(params, n_blocks, dim, compute_dtype=jnp.float32)

    logits = local_decoder_forward(p, c_planes, fused, n_blocks, padding)
    logits = jax.block_until_ready(logits)

    # Verify the Pallas MLP against the pure-JAX reference.
    c_ref = 0.0
    for plane in ("xz", "xy", "yz"):
        c_ref = c_ref + sample_plane_feature(p, c_planes[plane], plane, padding)
    ref = decoder_mlp_ref(p.reshape(B * T, dim),
                          c_ref.reshape(B * T, c_dim),
                          params, n_blocks).reshape(B, T)
    assert logits.shape == (B, T)
    assert jnp.max(jnp.abs(logits - ref)) < 1e-4, "mismatch vs reference"

    print("KERNEL_OK")
</pallas_src>

<mosaic_0001>
module attributes {stable_mosaic.version = 11 : i64} {
  func.func @_decoder_mlp_kernel(%arg0: i32, %arg1: memref<1x40x128xf32, #tpu.memory_space<vmem>>, %arg2: memref<3x32x40xf32, #tpu.memory_space<vmem>>, %arg3: memref<3x32x32xf32, #tpu.memory_space<vmem>>, %arg4: memref<3x32x1xf32, #tpu.memory_space<vmem>>, %arg5: memref<3x32x32xf32, #tpu.memory_space<vmem>>, %arg6: memref<3x32x1xf32, #tpu.memory_space<vmem>>, %arg7: memref<32x1xf32, #tpu.memory_space<vmem>>, %arg8: memref<1x1xf32, #tpu.memory_space<vmem>>, %arg9: memref<1x128xf32, #tpu.memory_space<vmem>>) attributes {dimension_semantics = [#tpu.dimension_semantics<parallel>], iteration_bounds = array<i64: 2>, scalar_prefetch = 0 : i64, scratch_operands = 0 : i64, tpu.core_type = #tpu.core_type<tc>, window_params = [{transform_indices = @transform_0, window_bounds = array<i64: 1, 40, 128>}, {pipeline_mode = #tpu.pipeline_mode<synchronous>, transform_indices = @transform_1, window_bounds = array<i64: 3, 32, 40>}, {pipeline_mode = #tpu.pipeline_mode<synchronous>, transform_indices = @transform_2, window_bounds = array<i64: 3, 32, 32>}, {pipeline_mode = #tpu.pipeline_mode<synchronous>, transform_indices = @transform_3, window_bounds = array<i64: 3, 32, 1>}, {pipeline_mode = #tpu.pipeline_mode<synchronous>, transform_indices = @transform_4, window_bounds = array<i64: 3, 32, 32>}, {pipeline_mode = #tpu.pipeline_mode<synchronous>, transform_indices = @transform_5, window_bounds = array<i64: 3, 32, 1>}, {pipeline_mode = #tpu.pipeline_mode<synchronous>, transform_indices = @transform_6, window_bounds = array<i64: 32, 1>}, {pipeline_mode = #tpu.pipeline_mode<synchronous>, transform_indices = @transform_7, window_bounds = array<i64: 1, 1>}, {transform_indices = @transform_8, window_bounds = array<i64: 1, 128>}]} {
    %c0 = arith.constant 0 : index
    %c0_0 = arith.constant 0 : index
    %c0_1 = arith.constant 0 : index
    %0 = vector.load %arg1[%c0, %c0_0, %c0_1] : memref<1x40x128xf32, #tpu.memory_space<vmem>>, vector<1x40x128xf32>
    %1 = vector.shape_cast %0 : vector<1x40x128xf32> to vector<40x128xf32>
    %c0_2 = arith.constant 0 : index
    %c0_3 = arith.constant 0 : index
    %c0_4 = arith.constant 0 : index
    %2 = vector.load %arg2[%c0_2, %c0_3, %c0_4] : memref<3x32x40xf32, #tpu.memory_space<vmem>>, vector<1x32x40xf32>
    %3 = vector.shape_cast %2 : vector<1x32x40xf32> to vector<32x40xf32>
    %cst = arith.constant dense<0.000000e+00> : vector<32x128xf32>
    %4 = tpu.matmul %3, %1, %cst {dimension_numbers = #tpu.dot_dimension_numbers<[1], [0], [0], [1], [0, 0, 1, 1], [], []>} : vector<32x40xf32>, vector<40x128xf32>, vector<32x128xf32> -> vector<32x128xf32>
    %c0_5 = arith.constant 0 : index
    %c0_6 = arith.constant 0 : index
    %c0_7 = arith.constant 0 : index
    %5 = vector.load %arg3[%c0_5, %c0_6, %c0_7] : memref<3x32x32xf32, #tpu.memory_space<vmem>>, vector<1x32x32xf32>
    %6 = vector.shape_cast %5 : vector<1x32x32xf32> to vector<32x32xf32>
    %cst_8 = arith.constant 0.000000e+00 : f32
    %7 = vector.broadcast %cst_8 : f32 to vector<32x128xf32>
    %8 = arith.maximumf %4, %7 : vector<32x128xf32>
    %cst_9 = arith.constant dense<0.000000e+00> : vector<32x128xf32>
    %9 = tpu.matmul %6, %8, %cst_9 {dimension_numbers = #tpu.dot_dimension_numbers<[1], [0], [0], [1], [0, 0, 1, 1], [], []>} : vector<32x32xf32>, vector<32x128xf32>, vector<32x128xf32> -> vector<32x128xf32>
    %c0_10 = arith.constant 0 : index
    %c0_11 = arith.constant 0 : index
    %c0_12 = arith.constant 0 : index
    %10 = vector.load %arg4[%c0_10, %c0_11, %c0_12] : memref<3x32x1xf32, #tpu.memory_space<vmem>>, vector<1x32x1xf32>
    %11 = vector.shape_cast %10 : vector<1x32x1xf32> to vector<32x1xf32>
    %12 = vector.broadcast %11 : vector<32x1xf32> to vector<32x128xf32>
    %13 = arith.addf %9, %12 : vector<32x128xf32>
    %c0_13 = arith.constant 0 : index
    %c0_14 = arith.constant 0 : index
    %c0_15 = arith.constant 0 : index
    %14 = vector.load %arg5[%c0_13, %c0_14, %c0_15] : memref<3x32x32xf32, #tpu.memory_space<vmem>>, vector<1x32x32xf32>
    %15 = vector.shape_cast %14 : vector<1x32x32xf32> to vector<32x32xf32>
    %cst_16 = arith.constant 0.000000e+00 : f32
    %16 = vector.broadcast %cst_16 : f32 to vector<32x128xf32>
    %17 = arith.maximumf %13, %16 : vector<32x128xf32>
    %cst_17 = arith.constant dense<0.000000e+00> : vector<32x128xf32>
    %18 = tpu.matmul %15, %17, %cst_17 {dimension_numbers = #tpu.dot_dimension_numbers<[1], [0], [0], [1], [0, 0, 1, 1], [], []>} : vector<32x32xf32>, vector<32x128xf32>, vector<32x128xf32> -> vector<32x128xf32>
    %c0_18 = arith.constant 0 : index
    %c0_19 = arith.constant 0 : index
    %c0_20 = arith.constant 0 : index
    %19 = vector.load %arg6[%c0_18, %c0_19, %c0_20] : memref<3x32x1xf32, #tpu.memory_space<vmem>>, vector<1x32x1xf32>
    %20 = vector.shape_cast %19 : vector<1x32x1xf32> to vector<32x1xf32>
    %21 = vector.broadcast %20 : vector<32x1xf32> to vector<32x128xf32>
    %22 = arith.addf %18, %21 : vector<32x128xf32>
    %23 = arith.addf %4, %22 : vector<32x128xf32>
    %c1 = arith.constant 1 : index
    %c0_21 = arith.constant 0 : index
    %c0_22 = arith.constant 0 : index
    %24 = vector.load %arg2[%c1, %c0_21, %c0_22] : memref<3x32x40xf32, #tpu.memory_space<vmem>>, vector<1x32x40xf32>
    %25 = vector.shape_cast %24 : vector<1x32x40xf32> to vector<32x40xf32>
    %cst_23 = arith.constant dense<0.000000e+00> : vector<32x128xf32>
    %26 = tpu.matmul %25, %1, %cst_23 {dimension_numbers = #tpu.dot_dimension_numbers<[1], [0], [0], [1], [0, 0, 1, 1], [], []>} : vector<32x40xf32>, vector<40x128xf32>, vector<32x128xf32> -> vector<32x128xf32>
    %27 = arith.addf %23, %26 : vector<32x128xf32>
    %c1_24 = arith.constant 1 : index
    %c0_25 = arith.constant 0 : index
    %c0_26 = arith.constant 0 : index
    %28 = vector.load %arg3[%c1_24, %c0_25, %c0_26] : memref<3x32x32xf32, #tpu.memory_space<vmem>>, vector<1x32x32xf32>
    %29 = vector.shape_cast %28 : vector<1x32x32xf32> to vector<32x32xf32>
    %cst_27 = arith.constant 0.000000e+00 : f32
    %30 = vector.broadcast %cst_27 : f32 to vector<32x128xf32>
    %31 = arith.maximumf %27, %30 : vector<32x128xf32>
    %cst_28 = arith.constant dense<0.000000e+00> : vector<32x128xf32>
    %32 = tpu.matmul %29, %31, %cst_28 {dimension_numbers = #tpu.dot_dimension_numbers<[1], [0], [0], [1], [0, 0, 1, 1], [], []>} : vector<32x32xf32>, vector<32x128xf32>, vector<32x128xf32> -> vector<32x128xf32>
    %c1_29 = arith.constant 1 : index
    %c0_30 = arith.constant 0 : index
    %c0_31 = arith.constant 0 : index
    %33 = vector.load %arg4[%c1_29, %c0_30, %c0_31] : memref<3x32x1xf32, #tpu.memory_space<vmem>>, vector<1x32x1xf32>
    %34 = vector.shape_cast %33 : vector<1x32x1xf32> to vector<32x1xf32>
    %35 = vector.broadcast %34 : vector<32x1xf32> to vector<32x128xf32>
    %36 = arith.addf %32, %35 : vector<32x128xf32>
    %c1_32 = arith.constant 1 : index
    %c0_33 = arith.constant 0 : index
    %c0_34 = arith.constant 0 : index
    %37 = vector.load %arg5[%c1_32, %c0_33, %c0_34] : memref<3x32x32xf32, #tpu.memory_space<vmem>>, vector<1x32x32xf32>
    %38 = vector.shape_cast %37 : vector<1x32x32xf32> to vector<32x32xf32>
    %cst_35 = arith.constant 0.000000e+00 : f32
    %39 = vector.broadcast %cst_35 : f32 to vector<32x128xf32>
    %40 = arith.maximumf %36, %39 : vector<32x128xf32>
    %cst_36 = arith.constant dense<0.000000e+00> : vector<32x128xf32>
    %41 = tpu.matmul %38, %40, %cst_36 {dimension_numbers = #tpu.dot_dimension_numbers<[1], [0], [0], [1], [0, 0, 1, 1], [], []>} : vector<32x32xf32>, vector<32x128xf32>, vector<32x128xf32> -> vector<32x128xf32>
    %c1_37 = arith.constant 1 : index
    %c0_38 = arith.constant 0 : index
    %c0_39 = arith.constant 0 : index
    %42 = vector.load %arg6[%c1_37, %c0_38, %c0_39] : memref<3x32x1xf32, #tpu.memory_space<vmem>>, vector<1x32x1xf32>
    %43 = vector.shape_cast %42 : vector<1x32x1xf32> to vector<32x1xf32>
    %44 = vector.broadcast %43 : vector<32x1xf32> to vector<32x128xf32>
    %45 = arith.addf %41, %44 : vector<32x128xf32>
    %46 = arith.addf %27, %45 : vector<32x128xf32>
    %c2 = arith.constant 2 : index
    %c0_40 = arith.constant 0 : index
    %c0_41 = arith.constant 0 : index
    %47 = vector.load %arg2[%c2, %c0_40, %c0_41] : memref<3x32x40xf32, #tpu.memory_space<vmem>>, vector<1x32x40xf32>
    %48 = vector.shape_cast %47 : vector<1x32x40xf32> to vector<32x40xf32>
    %cst_42 = arith.constant dense<0.000000e+00> : vector<32x128xf32>
    %49 = tpu.matmul %48, %1, %cst_42 {dimension_numbers = #tpu.dot_dimension_numbers<[1], [0], [0], [1], [0, 0, 1, 1], [], []>} : vector<32x40xf32>, vector<40x128xf32>, vector<32x128xf32> -> vector<32x128xf32>
    %50 = arith.addf %46, %49 : vector<32x128xf32>
    %c2_43 = arith.constant 2 : index
    %c0_44 = arith.constant 0 : index
    %c0_45 = arith.constant 0 : index
    %51 = vector.load %arg3[%c2_43, %c0_44, %c0_45] : memref<3x32x32xf32, #tpu.memory_space<vmem>>, vector<1x32x32xf32>
    %52 = vector.shape_cast %51 : vector<1x32x32xf32> to vector<32x32xf32>
    %cst_46 = arith.constant 0.000000e+00 : f32
    %53 = vector.broadcast %cst_46 : f32 to vector<32x128xf32>
    %54 = arith.maximumf %50, %53 : vector<32x128xf32>
    %cst_47 = arith.constant dense<0.000000e+00> : vector<32x128xf32>
    %55 = tpu.matmul %52, %54, %cst_47 {dimension_numbers = #tpu.dot_dimension_numbers<[1], [0], [0], [1], [0, 0, 1, 1], [], []>} : vector<32x32xf32>, vector<32x128xf32>, vector<32x128xf32> -> vector<32x128xf32>
    %c2_48 = arith.constant 2 : index
    %c0_49 = arith.constant 0 : index
    %c0_50 = arith.constant 0 : index
    %56 = vector.load %arg4[%c2_48, %c0_49, %c0_50] : memref<3x32x1xf32, #tpu.memory_space<vmem>>, vector<1x32x1xf32>
    %57 = vector.shape_cast %56 : vector<1x32x1xf32> to vector<32x1xf32>
    %58 = vector.broadcast %57 : vector<32x1xf32> to vector<32x128xf32>
    %59 = arith.addf %55, %58 : vector<32x128xf32>
    %c2_51 = arith.constant 2 : index
    %c0_52 = arith.constant 0 : index
    %c0_53 = arith.constant 0 : index
    %60 = vector.load %arg5[%c2_51, %c0_52, %c0_53] : memref<3x32x32xf32, #tpu.memory_space<vmem>>, vector<1x32x32xf32>
    %61 = vector.shape_cast %60 : vector<1x32x32xf32> to vector<32x32xf32>
    %cst_54 = arith.constant 0.000000e+00 : f32
    %62 = vector.broadcast %cst_54 : f32 to vector<32x128xf32>
    %63 = arith.maximumf %59, %62 : vector<32x128xf32>
    %cst_55 = arith.constant dense<0.000000e+00> : vector<32x128xf32>
    %64 = tpu.matmul %61, %63, %cst_55 {dimension_numbers = #tpu.dot_dimension_numbers<[1], [0], [0], [1], [0, 0, 1, 1], [], []>} : vector<32x32xf32>, vector<32x128xf32>, vector<32x128xf32> -> vector<32x128xf32>
    %c2_56 = arith.constant 2 : index
    %c0_57 = arith.constant 0 : index
    %c0_58 = arith.constant 0 : index
    %65 = vector.load %arg6[%c2_56, %c0_57, %c0_58] : memref<3x32x1xf32, #tpu.memory_space<vmem>>, vector<1x32x1xf32>
    %66 = vector.shape_cast %65 : vector<1x32x1xf32> to vector<32x1xf32>
    %67 = vector.broadcast %66 : vector<32x1xf32> to vector<32x128xf32>
    %68 = arith.addf %64, %67 : vector<32x128xf32>
    %69 = arith.addf %50, %68 : vector<32x128xf32>
    %cst_59 = arith.constant 0.000000e+00 : f32
    %70 = vector.broadcast %cst_59 : f32 to vector<32x128xf32>
    %71 = arith.maximumf %69, %70 : vector<32x128xf32>
    %c0_60 = arith.constant 0 : index
    %c0_61 = arith.constant 0 : index
    %72 = vector.load %arg7[%c0_60, %c0_61] : memref<32x1xf32, #tpu.memory_space<vmem>>, vector<32x1xf32>
    %73 = vector.broadcast %72 : vector<32x1xf32> to vector<32x128xf32>
    %74 = arith.mulf %71, %73 : vector<32x128xf32>
    %cst_62 = arith.constant dense<0.000000e+00> : vector<128xf32>
    %75 = vector.multi_reduction <add>, %74, %cst_62 [0] : vector<32x128xf32> to vector<128xf32>
    %76 = vector.shape_cast %75 : vector<128xf32> to vector<1x128xf32>
    %c0_63 = arith.constant 0 : index
    %c0_64 = arith.constant 0 : index
    %77 = vector.load %arg8[%c0_63, %c0_64] : memref<1x1xf32, #tpu.memory_space<vmem>>, vector<1x1xf32>
    %78 = vector.broadcast %77 : vector<1x1xf32> to vector<1x128xf32>
    %79 = arith.addf %76, %78 : vector<1x128xf32>
    %c0_65 = arith.constant 0 : index
    %c0_66 = arith.constant 0 : index
    %80 = vector.load %arg9[%c0_65, %c0_66] : memref<1x128xf32, #tpu.memory_space<vmem>>, vector<1x128xf32>
    tpu.vector_store %arg9[%c0_65, %c0_66], %79 {strides = array<i32>} : memref<1x128xf32, #tpu.memory_space<vmem>>, vector<1x128xf32>,
    return
  }
  func.func @transform_0(%arg0: i32) -> (i32, i32, i32) {
    %c0_i32 = arith.constant 0 : i32
    %c0_i32_0 = arith.constant 0 : i32
    %c0_i32_1 = arith.constant 0 : i32
    return %arg0, %c0_i32, %c0_i32_0 : i32, i32, i32
  }
  func.func @transform_1(%arg0: i32) -> (i32, i32, i32) {
    %c0_i32 = arith.constant 0 : i32
    %c0_i32_0 = arith.constant 0 : i32
    %c0_i32_1 = arith.constant 0 : i32
    %c0_i32_2 = arith.constant 0 : i32
    return %c0_i32, %c0_i32_0, %c0_i32_1 : i32, i32, i32
  }
  func.func @transform_2(%arg0: i32) -> (i32, i32, i32) {
    %c0_i32 = arith.constant 0 : i32
    %c0_i32_0 = arith.constant 0 : i32
    %c0_i32_1 = arith.constant 0 : i32
    %c0_i32_2 = arith.constant 0 : i32
    return %c0_i32, %c0_i32_0, %c0_i32_1 : i32, i32, i32
  }
  func.func @transform_3(%arg0: i32) -> (i32, i32, i32) {
    %c0_i32 = arith.constant 0 : i32
    %c0_i32_0 = arith.constant 0 : i32
    %c0_i32_1 = arith.constant 0 : i32
    %c0_i32_2 = arith.constant 0 : i32
    return %c0_i32, %c0_i32_0, %c0_i32_1 : i32, i32, i32
  }
  func.func @transform_4(%arg0: i32) -> (i32, i32, i32) {
    %c0_i32 = arith.constant 0 : i32
    %c0_i32_0 = arith.constant 0 : i32
    %c0_i32_1 = arith.constant 0 : i32
    %c0_i32_2 = arith.constant 0 : i32
    return %c0_i32, %c0_i32_0, %c0_i32_1 : i32, i32, i32
  }
  func.func @transform_5(%arg0: i32) -> (i32, i32, i32) {
    %c0_i32 = arith.constant 0 : i32
    %c0_i32_0 = arith.constant 0 : i32
    %c0_i32_1 = arith.constant 0 : i32
    %c0_i32_2 = arith.constant 0 : i32
    return %c0_i32, %c0_i32_0, %c0_i32_1 : i32, i32, i32
  }
  func.func @transform_6(%arg0: i32) -> (i32, i32) {
    %c0_i32 = arith.constant 0 : i32
    %c0_i32_0 = arith.constant 0 : i32
    %c0_i32_1 = arith.constant 0 : i32
    return %c0_i32, %c0_i32_0 : i32, i32
  }
  func.func @transform_7(%arg0: i32) -> (i32, i32) {
    %c0_i32 = arith.constant 0 : i32
    %c0_i32_0 = arith.constant 0 : i32
    %c0_i32_1 = arith.constant 0 : i32
    return %c0_i32, %c0_i32_0 : i32, i32
  }
  func.func @transform_8(%arg0: i32) -> (i32, i32) {
    %c0_i32 = arith.constant 0 : i32
    %c0_i32_0 = arith.constant 0 : i32
    return %c0_i32, %arg0 : i32, i32
  }
}

module attributes {stable_mosaic.version = 11 : i64} {
  func.func @_decoder_mlp_kernel(%arg0: i32, %arg1: memref<1x40x128xf32, #tpu.memory_space<vmem>>, %arg2: memref<3x32x40xf32, #tpu.memory_space<vmem>>, %arg3: memref<3x32x32xf32, #tpu.memory_space<vmem>>, %arg4: memref<3x32x1xf32, #tpu.memory_space<vmem>>, %arg5: memref<3x32x32xf32, #tpu.memory_space<vmem>>, %arg6: memref<3x32x1xf32, #tpu.memory_space<vmem>>, %arg7: memref<32x1xf32, #tpu.memory_space<vmem>>, %arg8: memref<1x1xf32, #tpu.memory_space<vmem>>, %arg9: memref<1x128xf32, #tpu.memory_space<vmem>>) attributes {dimension_semantics = [#tpu.dimension_semantics<parallel>], iteration_bounds = array<i64: 2>, scalar_prefetch = 0 : i64, scratch_operands = 0 : i64, tpu.core_type = #tpu.core_type<tc>, window_params = [{transform_indices = @transform_0, window_bounds = array<i64: 1, 40, 128>}, {pipeline_mode = #tpu.pipeline_mode<synchronous>, transform_indices = @transform_1, window_bounds = array<i64: 3, 32, 40>}, {pipeline_mode = #tpu.pipeline_mode<synchronous>, transform_indices = @transform_2, window_bounds = array<i64: 3, 32, 32>}, {pipeline_mode = #tpu.pipeline_mode<synchronous>, transform_indices = @transform_3, window_bounds = array<i64: 3, 32, 1>}, {pipeline_mode = #tpu.pipeline_mode<synchronous>, transform_indices = @transform_4, window_bounds = array<i64: 3, 32, 32>}, {pipeline_mode = #tpu.pipeline_mode<synchronous>, transform_indices = @transform_5, window_bounds = array<i64: 3, 32, 1>}, {pipeline_mode = #tpu.pipeline_mode<synchronous>, transform_indices = @transform_6, window_bounds = array<i64: 32, 1>}, {pipeline_mode = #tpu.pipeline_mode<synchronous>, transform_indices = @transform_7, window_bounds = array<i64: 1, 1>}, {transform_indices = @transform_8, window_bounds = array<i64: 1, 128>}]} {
    %c0 = arith.constant 0 : index
    %c0_0 = arith.constant 0 : index
    %c0_1 = arith.constant 0 : index
    %0 = vector.load %arg1[%c0, %c0_0, %c0_1] : memref<1x40x128xf32, #tpu.memory_space<vmem>>, vector<1x40x128xf32>
    %1 = vector.shape_cast %0 : vector<1x40x128xf32> to vector<40x128xf32>
    %c0_2 = arith.constant 0 : index
    %c0_3 = arith.constant 0 : index
    %c0_4 = arith.constant 0 : index
    %2 = vector.load %arg2[%c0_2, %c0_3, %c0_4] : memref<3x32x40xf32, #tpu.memory_space<vmem>>, vector<1x32x40xf32>
    %3 = vector.shape_cast %2 : vector<1x32x40xf32> to vector<32x40xf32>
    %cst = arith.constant dense<0.000000e+00> : vector<32x128xf32>
    %4 = tpu.matmul %3, %1, %cst {dimension_numbers = #tpu.dot_dimension_numbers<[1], [0], [0], [1], [0, 0, 1, 1], [], []>} : vector<32x40xf32>, vector<40x128xf32>, vector<32x128xf32> -> vector<32x128xf32>
    %c0_5 = arith.constant 0 : index
    %c0_6 = arith.constant 0 : index
    %c0_7 = arith.constant 0 : index
    %5 = vector.load %arg3[%c0_5, %c0_6, %c0_7] : memref<3x32x32xf32, #tpu.memory_space<vmem>>, vector<1x32x32xf32>
    %6 = vector.shape_cast %5 : vector<1x32x32xf32> to vector<32x32xf32>
    %cst_8 = arith.constant 0.000000e+00 : f32
    %7 = vector.broadcast %cst_8 : f32 to vector<32x128xf32>
    %8 = arith.maximumf %4, %7 : vector<32x128xf32>
    %cst_9 = arith.constant dense<0.000000e+00> : vector<32x128xf32>
    %9 = tpu.matmul %6, %8, %cst_9 {dimension_numbers = #tpu.dot_dimension_numbers<[1], [0], [0], [1], [0, 0, 1, 1], [], []>} : vector<32x32xf32>, vector<32x128xf32>, vector<32x128xf32> -> vector<32x128xf32>
    %c0_10 = arith.constant 0 : index
    %c0_11 = arith.constant 0 : index
    %c0_12 = arith.constant 0 : index
    %10 = vector.load %arg4[%c0_10, %c0_11, %c0_12] : memref<3x32x1xf32, #tpu.memory_space<vmem>>, vector<1x32x1xf32>
    %11 = vector.shape_cast %10 : vector<1x32x1xf32> to vector<32x1xf32>
    %12 = vector.broadcast %11 : vector<32x1xf32> to vector<32x128xf32>
    %13 = arith.addf %9, %12 : vector<32x128xf32>
    %c0_13 = arith.constant 0 : index
    %c0_14 = arith.constant 0 : index
    %c0_15 = arith.constant 0 : index
    %14 = vector.load %arg5[%c0_13, %c0_14, %c0_15] : memref<3x32x32xf32, #tpu.memory_space<vmem>>, vector<1x32x32xf32>
    %15 = vector.shape_cast %14 : vector<1x32x32xf32> to vector<32x32xf32>
    %cst_16 = arith.constant 0.000000e+00 : f32
    %16 = vector.broadcast %cst_16 : f32 to vector<32x128xf32>
    %17 = arith.maximumf %13, %16 : vector<32x128xf32>
    %cst_17 = arith.constant dense<0.000000e+00> : vector<32x128xf32>
    %18 = tpu.matmul %15, %17, %cst_17 {dimension_numbers = #tpu.dot_dimension_numbers<[1], [0], [0], [1], [0, 0, 1, 1], [], []>} : vector<32x32xf32>, vector<32x128xf32>, vector<32x128xf32> -> vector<32x128xf32>
    %c0_18 = arith.constant 0 : index
    %c0_19 = arith.constant 0 : index
    %c0_20 = arith.constant 0 : index
    %19 = vector.load %arg6[%c0_18, %c0_19, %c0_20] : memref<3x32x1xf32, #tpu.memory_space<vmem>>, vector<1x32x1xf32>
    %20 = vector.shape_cast %19 : vector<1x32x1xf32> to vector<32x1xf32>
    %21 = vector.broadcast %20 : vector<32x1xf32> to vector<32x128xf32>
    %22 = arith.addf %18, %21 : vector<32x128xf32>
    %23 = arith.addf %4, %22 : vector<32x128xf32>
    %c1 = arith.constant 1 : index
    %c0_21 = arith.constant 0 : index
    %c0_22 = arith.constant 0 : index
    %24 = vector.load %arg2[%c1, %c0_21, %c0_22] : memref<3x32x40xf32, #tpu.memory_space<vmem>>, vector<1x32x40xf32>
    %25 = vector.shape_cast %24 : vector<1x32x40xf32> to vector<32x40xf32>
    %cst_23 = arith.constant dense<0.000000e+00> : vector<32x128xf32>
    %26 = tpu.matmul %25, %1, %cst_23 {dimension_numbers = #tpu.dot_dimension_numbers<[1], [0], [0], [1], [0, 0, 1, 1], [], []>} : vector<32x40xf32>, vector<40x128xf32>, vector<32x128xf32> -> vector<32x128xf32>
    %27 = arith.addf %23, %26 : vector<32x128xf32>
    %c1_24 = arith.constant 1 : index
    %c0_25 = arith.constant 0 : index
    %c0_26 = arith.constant 0 : index
    %28 = vector.load %arg3[%c1_24, %c0_25, %c0_26] : memref<3x32x32xf32, #tpu.memory_space<vmem>>, vector<1x32x32xf32>
    %29 = vector.shape_cast %28 : vector<1x32x32xf32> to vector<32x32xf32>
    %cst_27 = arith.constant 0.000000e+00 : f32
    %30 = vector.broadcast %cst_27 : f32 to vector<32x128xf32>
    %31 = arith.maximumf %27, %30 : vector<32x128xf32>
    %cst_28 = arith.constant dense<0.000000e+00> : vector<32x128xf32>
    %32 = tpu.matmul %29, %31, %cst_28 {dimension_numbers = #tpu.dot_dimension_numbers<[1], [0], [0], [1], [0, 0, 1, 1], [], []>} : vector<32x32xf32>, vector<32x128xf32>, vector<32x128xf32> -> vector<32x128xf32>
    %c1_29 = arith.constant 1 : index
    %c0_30 = arith.constant 0 : index
    %c0_31 = arith.constant 0 : index
    %33 = vector.load %arg4[%c1_29, %c0_30, %c0_31] : memref<3x32x1xf32, #tpu.memory_space<vmem>>, vector<1x32x1xf32>
    %34 = vector.shape_cast %33 : vector<1x32x1xf32> to vector<32x1xf32>
    %35 = vector.broadcast %34 : vector<32x1xf32> to vector<32x128xf32>
    %36 = arith.addf %32, %35 : vector<32x128xf32>
    %c1_32 = arith.constant 1 : index
    %c0_33 = arith.constant 0 : index
    %c0_34 = arith.constant 0 : index
    %37 = vector.load %arg5[%c1_32, %c0_33, %c0_34] : memref<3x32x32xf32, #tpu.memory_space<vmem>>, vector<1x32x32xf32>
    %38 = vector.shape_cast %37 : vector<1x32x32xf32> to vector<32x32xf32>
    %cst_35 = arith.constant 0.000000e+00 : f32
    %39 = vector.broadcast %cst_35 : f32 to vector<32x128xf32>
    %40 = arith.maximumf %36, %39 : vector<32x128xf32>
    %cst_36 = arith.constant dense<0.000000e+00> : vector<32x128xf32>
    %41 = tpu.matmul %38, %40, %cst_36 {dimension_numbers = #tpu.dot_dimension_numbers<[1], [0], [0], [1], [0, 0, 1, 1], [], []>} : vector<32x32xf32>, vector<32x128xf32>, vector<32x128xf32> -> vector<32x128xf32>
    %c1_37 = arith.constant 1 : index
    %c0_38 = arith.constant 0 : index
    %c0_39 = arith.constant 0 : index
    %42 = vector.load %arg6[%c1_37, %c0_38, %c0_39] : memref<3x32x1xf32, #tpu.memory_space<vmem>>, vector<1x32x1xf32>
    %43 = vector.shape_cast %42 : vector<1x32x1xf32> to vector<32x1xf32>
    %44 = vector.broadcast %43 : vector<32x1xf32> to vector<32x128xf32>
    %45 = arith.addf %41, %44 : vector<32x128xf32>
    %46 = arith.addf %27, %45 : vector<32x128xf32>
    %c2 = arith.constant 2 : index
    %c0_40 = arith.constant 0 : index
    %c0_41 = arith.constant 0 : index
    %47 = vector.load %arg2[%c2, %c0_40, %c0_41] : memref<3x32x40xf32, #tpu.memory_space<vmem>>, vector<1x32x40xf32>
    %48 = vector.shape_cast %47 : vector<1x32x40xf32> to vector<32x40xf32>
    %cst_42 = arith.constant dense<0.000000e+00> : vector<32x128xf32>
    %49 = tpu.matmul %48, %1, %cst_42 {dimension_numbers = #tpu.dot_dimension_numbers<[1], [0], [0], [1], [0, 0, 1, 1], [], []>} : vector<32x40xf32>, vector<40x128xf32>, vector<32x128xf32> -> vector<32x128xf32>
    %50 = arith.addf %46, %49 : vector<32x128xf32>
    %c2_43 = arith.constant 2 : index
    %c0_44 = arith.constant 0 : index
    %c0_45 = arith.constant 0 : index
    %51 = vector.load %arg3[%c2_43, %c0_44, %c0_45] : memref<3x32x32xf32, #tpu.memory_space<vmem>>, vector<1x32x32xf32>
    %52 = vector.shape_cast %51 : vector<1x32x32xf32> to vector<32x32xf32>
    %cst_46 = arith.constant 0.000000e+00 : f32
    %53 = vector.broadcast %cst_46 : f32 to vector<32x128xf32>
    %54 = arith.maximumf %50, %53 : vector<32x128xf32>
    %cst_47 = arith.constant dense<0.000000e+00> : vector<32x128xf32>
    %55 = tpu.matmul %52, %54, %cst_47 {dimension_numbers = #tpu.dot_dimension_numbers<[1], [0], [0], [1], [0, 0, 1, 1], [], []>} : vector<32x32xf32>, vector<32x128xf32>, vector<32x128xf32> -> vector<32x128xf32>
    %c2_48 = arith.constant 2 : index
    %c0_49 = arith.constant 0 : index
    %c0_50 = arith.constant 0 : index
    %56 = vector.load %arg4[%c2_48, %c0_49, %c0_50] : memref<3x32x1xf32, #tpu.memory_space<vmem>>, vector<1x32x1xf32>
    %57 = vector.shape_cast %56 : vector<1x32x1xf32> to vector<32x1xf32>
    %58 = vector.broadcast %57 : vector<32x1xf32> to vector<32x128xf32>
    %59 = arith.addf %55, %58 : vector<32x128xf32>
    %c2_51 = arith.constant 2 : index
    %c0_52 = arith.constant 0 : index
    %c0_53 = arith.constant 0 : index
    %60 = vector.load %arg5[%c2_51, %c0_52, %c0_53] : memref<3x32x32xf32, #tpu.memory_space<vmem>>, vector<1x32x32xf32>
    %61 = vector.shape_cast %60 : vector<1x32x32xf32> to vector<32x32xf32>
    %cst_54 = arith.constant 0.000000e+00 : f32
    %62 = vector.broadcast %cst_54 : f32 to vector<32x128xf32>
    %63 = arith.maximumf %59, %62 : vector<32x128xf32>
    %cst_55 = arith.constant dense<0.000000e+00> : vector<32x128xf32>
    %64 = tpu.matmul %61, %63, %cst_55 {dimension_numbers = #tpu.dot_dimension_numbers<[1], [0], [0], [1], [0, 0, 1, 1], [], []>} : vector<32x32xf32>, vector<32x128xf32>, vector<32x128xf32> -> vector<32x128xf32>
    %c2_56 = arith.constant 2 : index
    %c0_57 = arith.constant 0 : index
    %c0_58 = arith.constant 0 : index
    %65 = vector.load %arg6[%c2_56, %c0_57, %c0_58] : memref<3x32x1xf32, #tpu.memory_space<vmem>>, vector<1x32x1xf32>
    %66 = vector.shape_cast %65 : vector<1x32x1xf32> to vector<32x1xf32>
    %67 = vector.broadcast %66 : vector<32x1xf32> to vector<32x128xf32>
    %68 = arith.addf %64, %67 : vector<32x128xf32>
    %69 = arith.addf %50, %68 : vector<32x128xf32>
    %cst_59 = arith.constant 0.000000e+00 : f32
    %70 = vector.broadcast %cst_59 : f32 to vector<32x128xf32>
    %71 = arith.maximumf %69, %70 : vector<32x128xf32>
    %c0_60 = arith.constant 0 : index
    %c0_61 = arith.constant 0 : index
    %72 = vector.load %arg7[%c0_60, %c0_61] : memref<32x1xf32, #tpu.memory_space<vmem>>, vector<32x1xf32>
    %73 = vector.broadcast %72 : vector<32x1xf32> to vector<32x128xf32>
    %74 = arith.mulf %71, %73 : vector<32x128xf32>
    %cst_62 = arith.constant dense<0.000000e+00> : vector<128xf32>
    %75 = vector.multi_reduction <add>, %74, %cst_62 [0] : vector<32x128xf32> to vector<128xf32>
    %76 = vector.shape_cast %75 : vector<128xf32> to vector<1x128xf32>
    %c0_63 = arith.constant 0 : index
    %c0_64 = arith.constant 0 : index
    %77 = vector.load %arg8[%c0_63, %c0_64] : memref<1x1xf32, #tpu.memory_space<vmem>>, vector<1x1xf32>
    %78 = vector.broadcast %77 : vector<1x1xf32> to vector<1x128xf32>
    %79 = arith.addf %76, %78 : vector<1x128xf32>
    %c0_65 = arith.constant 0 : index
    %c0_66 = arith.constant 0 : index
    %80 = vector.load %arg9[%c0_65, %c0_66] : memref<1x128xf32, #tpu.memory_space<vmem>>, vector<1x128xf32>
    tpu.vector_store %arg9[%c0_65, %c0_66], %79 {strides = array<i32>} : memref<1x128xf32, #tpu.memory_space<vmem>>, vector<1x128xf32>,
    return
  }
  func.func @transform_0(%arg0: i32) -> (i32, i32, i32) {
    %c0_i32 = arith.constant 0 : i32
    %c0_i32_0 = arith.constant 0 : i32
    %c0_i32_1 = arith.constant 0 : i32
    return %arg0, %c0_i32, %c0_i32_0 : i32, i32, i32
  }
  func.func @transform_1(%arg0: i32) -> (i32, i32, i32) {
    %c0_i32 = arith.constant 0 : i32
    %c0_i32_0 = arith.constant 0 : i32
    %c0_i32_1 = arith.constant 0 : i32
    %c0_i32_2 = arith.constant 0 : i32
    return %c0_i32, %c0_i32_0, %c0_i32_1 : i32, i32, i32
  }
  func.func @transform_2(%arg0: i32) -> (i32, i32, i32) {
    %c0_i32 = arith.constant 0 : i32
    %c0_i32_0 = arith.constant 0 : i32
    %c0_i32_1 = arith.constant 0 : i32
    %c0_i32_2 = arith.constant 0 : i32
    return %c0_i32, %c0_i32_0, %c0_i32_1 : i32, i32, i32
  }
  func.func @transform_3(%arg0: i32) -> (i32, i32, i32) {
    %c0_i32 = arith.constant 0 : i32
    %c0_i32_0 = arith.constant 0 : i32
    %c0_i32_1 = arith.constant 0 : i32
    %c0_i32_2 = arith.constant 0 : i32
    return %c0_i32, %c0_i32_0, %c0_i32_1 : i32, i32, i32
  }
  func.func @transform_4(%arg0: i32) -> (i32, i32, i32) {
    %c0_i32 = arith.constant 0 : i32
    %c0_i32_0 = arith.constant 0 : i32
    %c0_i32_1 = arith.constant 0 : i32
    %c0_i32_2 = arith.constant 0 : i32
    return %c0_i32, %c0_i32_0, %c0_i32_1 : i32, i32, i32
  }
  func.func @transform_5(%arg0: i32) -> (i32, i32, i32) {
    %c0_i32 = arith.constant 0 : i32
    %c0_i32_0 = arith.constant 0 : i32
    %c0_i32_1 = arith.constant 0 : i32
    %c0_i32_2 = arith.constant 0 : i32
    return %c0_i32, %c0_i32_0, %c0_i32_1 : i32, i32, i32
  }
  func.func @transform_6(%arg0: i32) -> (i32, i32) {
    %c0_i32 = arith.constant 0 : i32
    %c0_i32_0 = arith.constant 0 : i32
    %c0_i32_1 = arith.constant 0 : i32
    return %c0_i32, %c0_i32_0 : i32, i32
  }
  func.func @transform_7(%arg0: i32) -> (i32, i32) {
    %c0_i32 = arith.constant 0 : i32
    %c0_i32_0 = arith.constant 0 : i32
    %c0_i32_1 = arith.constant 0 : i32
    return %c0_i32, %c0_i32_0 : i32, i32
  }
  func.func @transform_8(%arg0: i32) -> (i32, i32) {
    %c0_i32 = arith.constant 0 : i32
    %c0_i32_0 = arith.constant 0 : i32
    return %c0_i32, %arg0 : i32, i32
  }
}

</mosaic_0001>

<bundles_post_ra>
// kernel: tpu_custom_call.1
= control target key start
LH: loop header
LB: loop body
LE: loop exit
PB: predicated region body
PF: predicated region fallthrough
CT: control target
= control target key end

     0   :  { %s2700_s0 = inlined_call_operand.hbm [shape: f32[2,40,128], index: 0, kind: input, shape index: {}]   ;;  %s2701_s1 = inlined_call_operand.vmem [shape: f32[3,32,40], index: 1, kind: input, shape index: {}]   ;;  %s2702_s2 = inlined_call_operand.vmem [shape: f32[3,32,32], index: 2, kind: input, shape index: {}]   ;;  %s2703_s3 = inlined_call_operand.vmem [shape: f32[3,32,1], index: 3, kind: input, shape index: {}]   ;;  %s2704_s4 = inlined_call_operand.hbm [shape: f32[3,32,32], index: 4, kind: input, shape index: {}]   ;;  %s2705_s5 = inlined_call_operand.vmem [shape: f32[3,32,1], index: 5, kind: input, shape index: {}]   ;;  %s2706_s6 = inlined_call_operand.vmem [shape: f32[32,1], index: 6, kind: input, shape index: {}]   ;;  %s2707_s7 = inlined_call_operand.<no memory space> [shape: f32[1,1], index: 7, kind: input, shape index: {}]   ;;  %s2708_s8 = inlined_call_operand.hbm [shape: f32[1,256], index: 8, kind: output, shape index: {}]  }
   0x1   :  { %2714 = sst [smem:[#allocation12_spill]] %s2704_s4  ;;  %v13_v0 = vstv %s2707_s7 }
   0x2   :  { %14 = vst [vmem:[#allocation2] sm:$0x1] %v13_v0 }
   0x3   :  { %15 = vsyncpa [#allocation4], 0 }
   0x4   :  { %17 = vsyncpa [#allocation4 + $0x1], 0 }
   0x5   :  { %18 = vsyncpa [#allocation7], 0 }
   0x6   :  { %19 = vsyncpa [#allocation5], 0 }
   0x7   :  { %21 = vsyncpa [#allocation5 + $0x1], 0  ;;  %s2230_s29 = smov 0   ;;  %s2232_s30 = smov 0  }
   0x8   :  { %s2234_s9 = smov 0   ;;  %s2236_s10 = smov 0  }
   0x9 LB: > { %s2251_s7 = sadd.s32 4294967295, %s2174_s10   ;;  %s1596_s11 = sadd.s32 4294967294, %s2174_s10   ;;  %s2174_s10 = sphi %s2236_s10, %s2734_s10   ;;  %s2170_s9 = sphi %s2234_s9, %s2733_s9   ;;  %s2166_s30 = sphi %s2232_s30, %s2732_s30   ;;  %s2162_s29 = sphi %s2230_s29, %s2731_s29  }
   0xa   : > { %p47_p0 = scmp.ne.s32.totalorder %s2166_s30, %s2162_s29  ;;  %p2709_p1 = scmp.eq.s32.totalorder %s2251_s7, 0 }
   0xb   : > { %p224_p3 = scmp.eq.s32.totalorder %s1596_s11, 1  ;;  %p1597_p5 = scmp.ge.s32.totalorder %s2174_s10, 1 }
   0xc   : > { %p2260_p4 = por %p2709_p1, %p47_p0  ;;  %p231_p7 = scmp.lt.s32.totalorder %s2174_s10, 3 }
   0xd   : > { %p2265_p6 = por %p224_p3, %p47_p0  ;;  %s2176_s15 = smov [#allocation6]  }
   0xe   : > { %s2715_s12 = scalar_select %p2260_p4, 1, 0 }
   0xf   : > { %s2716_s13 = scalar_select %p2265_p6, 1, 0 }
  0x10   : > { %p2270_p8 = pnand %p1597_p5, %p231_p7  ;;  %s252_s16 = sshll.u32 %s2176_s15, 4  ;;  %s2274_s16 = int_to_ptr.vmem [resolvable:$true] %s252_s16 }
  0x11   : > { %s2286_s18 = sadd.s32 1, %s2174_s10   ;;  %s34_s19 = sadd.s32 1, %s2170_s9 }
  0x12   : > { %s2717_s14 = scalar_select %p2270_p8, 1, 0 }
  0x13   : > { %p1992_p9 = pneg %p2270_p8  ;;  %s31_s20 = ssub.s32 %s2174_s10, %s2286_s18 }
  0x14   : > { %s2719_s4 = sld [smem:[#allocation12_spill]] }
  0x15   : > { %p2281_p11 = pnand %p1992_p9, %p2709_p1 }
  0x17   : > { %p2048_p13 = pneg %p2281_p11 }
  0x1a   : > { %s2046_s23 = scalar_lea.hbm %s2719_s4, 1536 }
  0x1b   : > { %p2047_p12 = scmp.ne.s32.totalorder %s2719_s4, %s2046_s23  ;;  %p2053_p5 = scmp.lt.u32.totalorder %s2046_s23, %s2719_s4 }
  0x1d   : > { %p2049_p0 = pnand %p2048_p13, %p2047_p12 }
  0x1f   : > { %p2050_p3 = pneg %p2049_p0 }
  0x21   : > { %p2055_p7 = pnand %p2053_p5, %p2050_p3 }
  0x23   : > { %2058 = shalt.err (!%p2055_p7)
}
  0x24   : > { %s2059_s28 = scalar_lea.vmem %s2274_s16, 1536  ;;  %p2067_p2 = scmp.lt.s32.totalorder %s2274_s16, %s2274_s16 }
  0x25   : > { %p2060_p9 = scmp.ne.s32.totalorder %s2274_s16, %s2059_s28  ;;  %p2068_p6 = scmp.lt.s32.totalorder %s2059_s28, %s2059_s28 }
  0x27   : > { %p2062_p10 = pnand %p2060_p9, %p2048_p13  ;;  %p2069_p4 = por %p2068_p6, %p2067_p2 }
  0x29   : > { %p2063_p1 = pneg %p2062_p10 }
  0x2b   : > { %p2070_p8 = pnand %p2069_p4, %p2063_p1 }
  0x2d   : > { %2073 = shalt.err (!%p2070_p8)
}
  0x2e   : > { %s2712_s11 = smov 128   ;;  %s2713_s15 = smov 8  }
  0x2f   : > { %1995 = dma.hbm_to_vmem [thread:$0]  (!%p2281_p11), %s2719_s4, 1536, %s2274_s16, [#allocation7], %s2712_s11, %s2712_s11, %s2713_s15  }
  0x30   : > { %p32_p1 = scmp.eq.s32.totalorder %s31_s20, 0  ;;  %p41_p2 = scmp.ne.s32.totalorder %s2170_s9, %s2166_s30 }
  0x31   : > { %p42_p4 = scmp.eq.s32.totalorder %s2174_s10, 0  ;;  %p2005_p6 = scmp.lt.s32.totalorder %s2174_s10, 2 }
  0x32   : > { %s2320_s23 = scalar_select %p32_p1, %s2170_s9, %s34_s19  }
  0x33   : > { %p43_p8 = por %p42_p4, %p41_p2  ;;  %p2720_p10 = scmp.eq.s32.totalorder %s2251_s7, 1 }
  0x34   : > { %s275_s17 = sand.u32 1, %s2170_s9   ;;  %s1982_s25 = smul.u32 640, %s2174_s10 }
  0x35   : > { %p2324_p12 = por %p2720_p10, %p41_p2  ;;  %s1981_s26 = smul.u32 40, %s275_s17 }
  0x36   : > { %p2330_p13 = pnand %p2005_p6, %p43_p8  ;;  %s2337_s19 = scalar_lea.hbm %s2700_s0, %s1982_s25 }
  0x37   : > { %s279_s28 = scalar_lea.vmem [#allocation3], %s1981_s26  ;;  %s2341_s22 = scalar_lea.sflag [#allocation4], %s275_s17 }
  0x38   : > { %s286_s21 = sshll.u32 %s279_s28, 4  ;;  %s2074_s11 = scalar_lea.hbm %s2337_s19, 640  ;;  %s2339_s21 = int_to_ptr.vmem [resolvable:$true] %s286_s21 }
  0x39   : > { %p2075_p11 = scmp.ne.s32.totalorder %s2337_s19, %s2074_s11  ;;  %p2076_p0 = pneg %p2330_p13 }
  0x3a   : > { %s2079_s20 = scalar_lea.hbm %s2700_s0, 1280  ;;  %p2080_p7 = scmp.lt.u32.totalorder %s2337_s19, %s2700_s0 }
  0x3b   : > { %p2077_p3 = pnand %p2076_p0, %p2075_p11  ;;  %p2081_p9 = scmp.lt.u32.totalorder %s2079_s20, %s2074_s11 }
  0x3c   : > { %p2083_p2 = scmp.lt.u32.totalorder %s2074_s11, %s2337_s19 }
  0x3d   : > { %p2078_p5 = pneg %p2077_p3  ;;  %p2082_p1 = por %p2081_p9, %p2080_p7 }
  0x3f   : > { %p2084_p4 = por %p2083_p2, %p2082_p1 }
  0x41   : > { %p2085_p6 = pnand %p2084_p4, %p2078_p5 }
  0x43   : > { %2088 = shalt.err (!%p2085_p6)
}
  0x44   : > { %s2089_s17 = scalar_lea.vmem %s2339_s21, 640  ;;  %s2179_s26 = smov [#allocation3]  }
  0x45   : > { %p2090_p8 = scmp.ne.s32.totalorder %s2339_s21, %s2089_s17  ;;  %s2094_s28 = sshll.u32 %s2179_s26, 4  ;;  %s2095_s28 = int_to_ptr.vmem [resolvable:$false] %s2094_s28 }
  0x46   : > { %s2096_s4 = scalar_lea.vmem %s2095_s28, 1280  ;;  %p2097_p3 = scmp.lt.s32.totalorder %s2339_s21, %s2095_s28 }
  0x47   : > { %p2092_p10 = pnand %p2090_p8, %p2076_p0  ;;  %p2098_p7 = scmp.lt.s32.totalorder %s2096_s4, %s2089_s17 }
  0x49   : > { %p2093_p11 = pneg %p2092_p10  ;;  %p2099_p9 = por %p2098_p7, %p2097_p3 }
  0x4b   : > { %p2100_p1 = pnand %p2099_p9, %p2093_p11 }
  0x4d   : > { %2103 = shalt.err (!%p2100_p1)
}
  0x4e   : > { %s2723_s11 = smov 8   ;;  %s2724_s15 = smov 128  }
  0x4f   : > { %1999 = dma.hbm_to_vmem [thread:$0]  (!%p2330_p13), %s2337_s19, 640, %s2339_s21, %s2341_s22, %s2724_s15, %s2724_s15, %s2723_s11  }
  0x50   : > { %p2725_p0 = scmp.ne.s32.totalorder %s2717_s14, 0 }
  0x51   : > { %s2375_s25 = sand.u32 (!%p2725_p0), 1, %s2166_s30   ;;  %p2726_p5 = scmp.ne.s32.totalorder (!%p2725_p0), %s2715_s12, 0 }
  0x52   : > { %298 = sbr.rel (%p2725_p0) target bundleno = 1741 (0x6cd), region = 52  ;;  %s301_s20 = scalar_lea.sflag (!%p2725_p0), [#allocation4], %s2375_s25 }
  0x53   : > { %s1983_s16 = smul.u32 (!%p2725_p0), 40, %s2375_s25 }
  0x55   : > { %s304_s17 = scalar_lea.vmem (!%p2725_p0), [#allocation3], %s1983_s16 }
  0x59   : > { %2149 = dma.done.wait (%p2726_p5), %s301_s20, 640  }
  0x5a   : > { %2151 = vsyncadd (%p2726_p5), %s301_s20, 4294966656  ;;  %p2727_p2 = scmp.eq.s32.totalorder %s2251_s7, 0 }
  0x5c   : > { %2153 = dma.done.wait (%p2727_p2), [#allocation7], 1536   ;;  %p2728_p13 = pmov %p2727_p2 }
  0x5d   : > { %v2180_v1 = vmov 0   ;;  %vm349_vm0 = vcmask 326656   ;;  %v340_v2 = vld [vmem:[%s304_s17] sm:$0xff]  ;;  %v341_v3 = vld [vmem:[%s304_s17 + $0x8] sm:$0xff]  ;;  %v342_v4 = vld [vmem:[%s304_s17 + $0x10] sm:$0xff]  ;;  %vm479_vm1 = vcmask 261120  }
  0x5e   : > { %2155 = vsyncadd (%p2728_p13), [#allocation7], 4294965760  ;;  %2045 = vset.pattern.permute.xlu1 %v2180_v1  ;;  %2044 = vset.pattern.permute.xlu0 %v2180_v1  ;;  %v2387_v5 = vpack.c.bf16 %v341_v3, %v340_v2  ;;  %v343_v6 = vld [vmem:[%s304_s17 + $0x18] sm:$0xff]  ;;  %v457_v9 = vld [vmem:[%s2703_s3 + $0x10] sm:$0xff]  ;;  %s1671_s26 = sshll.u32 %s2251_s7, 4  ;;  %s339_s28 = scalar_lea.vmem [#allocation8], %s2375_s25 }
  0x5f   : > { %v345_v7 = vld [vmem:[%s2701_s1] sm:$0xff]  ;;  %v2392_v8 = vpack.c.bf16 %v343_v6, %v342_v4  ;;  %471 = vperm.xlu1 %2045, %v457_v9   ;;  %v458_v11 = vld [vmem:[%s2703_s3 + $0x18] sm:$0xff]  ;;  %v456_v13 = vld [vmem:[%s2703_s3 + $0x8] sm:$0xff]  ;;  %s1520_s4 = sshll.u32 %s339_s28, 4  ;;  %s2656_s16 = scalar_lea.hbm %s2708_s8, %s1671_s26  ;;  %s2658_s4 = int_to_ptr.vmem [resolvable:$true] %s1520_s4 }
  0x60   : > { %1759 = vmatprep.mubr.msk.f32.mxu0 %vm349_vm0, %v345_v7  ;;  %1882 = vmatprep.subr.bf16.mxu0 %v2387_v5  ;;  %v455_v10 = vld [vmem:[%s2703_s3] sm:$0xff]  ;;  %v586_v14 = vld [vmem:[%s2705_s5 + $0x8] sm:$0xff]  ;;  %v347_v17 = vld [vmem:[%s2701_s1 + $0x10] sm:$0xff]  ;;  %s1508_s20 = scalar_lea.sflag [#allocation5], %s2375_s25  ;;  %s2104_s14 = scalar_lea.vmem %s2658_s4, 16 }
  0x61   : > { %1884 = vmatpush3.bf16.msra.mxu0 %v2387_v5  ;;  %461 = vperm.xlu0 %2044, %v455_v10   ;;  %v2407_v12 = vld [vmem:[%s304_s17 + $0x20] sm:$0xff]  ;;  %v588_v18 = vld [vmem:[%s2705_s5 + $0x18] sm:$0xff]  ;;  %v1495_v42 = vld [vmem:[#allocation2] sm:$0x1]  ;;  %p2105_p4 = scmp.ne.s32.totalorder %s2658_s4, %s2104_s14  ;;  %s2181_s7 = smov [#allocation8]  }
  0x62   : > { %1886 = vmatprep.subr.bf16.mxu0 %v2392_v8  ;;  %v346_v15 = vld [vmem:[%s2701_s1 + $0x8] sm:$0xff]  ;;  %v585_v16 = vld [vmem:[%s2705_s5] sm:$0xff]  ;;  %v348_v19 = vld [vmem:[%s2701_s1 + $0x18] sm:$0xff]  ;;  %s2108_s17 = sshll.u32 %s2181_s7, 4  ;;  %s2109_s17 = int_to_ptr.vmem [resolvable:$false] %s2108_s17 }
  0x63   : > { %476 = vperm.xlu1 %2045, %v458_v11   ;;  %v587_v20 = vld [vmem:[%s2705_s5 + $0x10] sm:$0xff]  ;;  %v447_v21 = vld [vmem:[%s2702_s2] sm:$0xff]  ;;  %v1628_v23 = vld [vmem:[%s2703_s3 + $0x28] sm:$0xff]  ;;  %p2106_p6 = pnand %p2105_p4, %p2324_p12  ;;  %s2110_s27 = scalar_lea.vmem %s2109_s17, 32 }
  0x64   : > { %1773 = vmatprep.mubr.msk.f32.mxu1 %vm479_vm1, %v447_v21  ;;  %v1627_v22 = vld [vmem:[%s2703_s3 + $0x20] sm:$0xff]  ;;  %v1629_v24 = vld [vmem:[%s2703_s3 + $0x30] sm:$0xff]  ;;  %v1630_v25 = vld [vmem:[%s2703_s3 + $0x38] sm:$0xff]  ;;  %p2111_p10 = scmp.lt.s32.totalorder %s2658_s4, %s2109_s17  ;;  %p2112_p11 = scmp.lt.s32.totalorder %s2110_s27, %s2104_s14 }
  0x65   : > { %1888 = vmatpush3.bf16.msra.mxu0 %v2392_v8  ;;  %466 = vperm.xlu0 %2044, %v456_v13   ;;  %v1635_v26 = vld [vmem:[%s2705_s5 + $0x20] sm:$0xff]  ;;  %v1636_v27 = vld [vmem:[%s2705_s5 + $0x28] sm:$0xff]  ;;  %v1637_v28 = vld [vmem:[%s2705_s5 + $0x30] sm:$0xff]  ;;  %p2107_p8 = pneg %p2106_p6 }
  0x66   : > { %1757 = vmatprep.subr.mxu0 %v2407_v12  ;;  %v1638_v29 = vld [vmem:[%s2705_s5 + $0x38] sm:$0xff]  ;;  %v1655_v30 = vld [vmem:[%s2703_s3 + $0x40] sm:$0xff]  ;;  %v1656_v31 = vld [vmem:[%s2703_s3 + $0x48] sm:$0xff]  ;;  %p2113_p3 = por %p2112_p11, %p2111_p10 }
  0x67   : > { %596 = vperm.xlu1 %2045, %v586_v14   ;;  %v1657_v32 = vld [vmem:[%s2703_s3 + $0x50] sm:$0xff]  ;;  %v1658_v33 = vld [vmem:[%s2703_s3 + $0x58] sm:$0xff]  ;;  %v1663_v34 = vld [vmem:[%s2705_s5 + $0x40] sm:$0xff] }
  0x68   : > { %v1664_v35 = vld [vmem:[%s2705_s5 + $0x48] sm:$0xff]  ;;  %v1665_v36 = vld [vmem:[%s2705_s5 + $0x50] sm:$0xff]  ;;  %v1666_v37 = vld [vmem:[%s2705_s5 + $0x58] sm:$0xff]  ;;  %p2114_p7 = pnand %p2113_p3, %p2107_p8 }
  0x69   : > { %1758 = vmatpush3.msra.mxu0 %v2407_v12  ;;  %591 = vperm.xlu0 %2044, %v585_v16   ;;  %v1458_v38 = vld [vmem:[%s2706_s6] sm:$0xff]  ;;  %v1459_v39 = vld [vmem:[%s2706_s6 + $0x8] sm:$0xff]  ;;  %v1460_v40 = vld [vmem:[%s2706_s6 + $0x10] sm:$0xff] }
  0x6a   : > { %1760 = vmatmul.mubr.msk.f32.vlgmr.msra.gmra.mrb[0].mxu0 %vm349_vm0, %v346_v15  ;;  %v1461_v41 = vld [vmem:[%s2706_s6 + $0x18] sm:$0xff]  ;;  %v448_v53 = vld [vmem:[%s2702_s2 + $0x8] sm:$0xff]  ;;  %v449_v54 = vld [vmem:[%s2702_s2 + $0x10] sm:$0xff] }
  0x6b   : > { %1762 = vmatprep.mubr.msk.f32.mxu0 %vm349_vm0, %v347_v17  ;;  %606 = vperm.xlu1 %2045, %v588_v18   ;;  %v450_v55 = vld [vmem:[%s2702_s2 + $0x18] sm:$0xff]  ;;  %v579_v15 = vld [vmem:[#allocation6 + $0x10] sm:$0xff]  ;;  %v580_v16 = vld [vmem:[#allocation6 + $0x18] sm:$0xff] }
  0x6c   : > { %v577_v56 = vld [vmem:[#allocation6] sm:$0xff]  ;;  %v578_v14 = vld [vmem:[#allocation6 + $0x8] sm:$0xff]  ;;  %v1616_v18 = vld [vmem:[%s2701_s1 + $0x28] sm:$0xff] }
  0x6d   : > { %601 = vperm.xlu0 %2044, %v587_v20   ;;  %v1615_v17 = vld [vmem:[%s2701_s1 + $0x20] sm:$0xff]  ;;  %v1618_v20 = vld [vmem:[%s2701_s1 + $0x38] sm:$0xff] }
  0x6e   : > { %1763 = vmatmul.mubr.msk.f32.gmra.mrb[2].mxu0 %vm349_vm0, %v348_v19  ;;  %v1617_v19 = vld [vmem:[%s2701_s1 + $0x30] sm:$0xff]  ;;  %v1623_v21 = vld [vmem:[%s2702_s2 + $0x20] sm:$0xff] }
  0x6f   : > { %837 = vperm.xlu1 %2045, %v1628_v23   ;;  %1817 = vmatprep.mubr.msk.f32.mxu0 %vm479_vm1, %v1623_v21  ;;  %v1645_v21 = vld [vmem:[%s2701_s1 + $0x50] sm:$0xff] }
  0x71   : > { %832 = vperm.xlu0 %2044, %v1627_v22  }
  0x73   : > { %847 = vperm.xlu1 %2045, %v1630_v25  }
  0x75   : > { %842 = vperm.xlu0 %2044, %v1629_v24  }
  0x77   : > { %968 = vperm.xlu1 %2045, %v1636_v27  }
  0x79   : > { %963 = vperm.xlu0 %2044, %v1635_v26  }
  0x7b   : > { %978 = vperm.xlu1 %2045, %v1638_v29  }
  0x7d   : > { %973 = vperm.xlu0 %2044, %v1637_v28  }
  0x7f   : > { %1209 = vperm.xlu1 %2045, %v1656_v31  }
  0x81   : > { %1204 = vperm.xlu0 %2044, %v1655_v30  }
  0x83   : > { %1219 = vperm.xlu1 %2045, %v1658_v33  }
  0x85   : > { %1214 = vperm.xlu0 %2044, %v1657_v32  }
  0x87   : > { %1340 = vperm.xlu1 %2045, %v1664_v35  }
  0x89   : > { %1335 = vperm.xlu0 %2044, %v1663_v34  }
  0x8b   : > { %1350 = vperm.xlu1 %2045, %v1666_v37  }
  0x8d   : > { %1345 = vperm.xlu0 %2044, %v1665_v36  }
  0x8f   : > { %1469 = vperm.xlu1 %2045, %v1459_v39  }
  0x91   : > { %1464 = vperm.xlu0 %2044, %v1458_v38  }
  0x93   : > { %1479 = vperm.xlu1 %2045, %v1461_v41  }
  0x95   : > { %1474 = vperm.xlu0 %2044, %v1460_v40  }
  0x99   : > { %1498 = vperm.xlu0 %2044, %v1495_v42  }
  0xde   : > { %v472_v58 = vpop.permute.xlu1 %471 }
  0xe0   : > { %v462_v57 = vpop.permute.xlu0 %461 }
  0xe2   : > { %v477_v1 = vpop.permute.xlu1 %476 }
  0xe4   : > { %v467_v59 = vpop.permute.xlu0 %466 }
  0xe6   : > { %v597_v22 = vpop.permute.xlu1 %596 }
  0xe7   : > { %v693_v24 = vadd.f32 nan, %v597_v22 }
  0xe8   : > { %v592_v23 = vpop.permute.xlu0 %591 }
  0xe9   : > { %v688_v25 = vadd.f32 nan, %v592_v23 }
  0xea   : > { %v607_v26 = vpop.permute.xlu1 %606 }
  0xeb   : > { %v703_v30 = vadd.f32 nan, %v607_v26 }
  0xec   : > { %v602_v27 = vpop.permute.xlu0 %601 }
  0xed   : > { %v698_v33 = vadd.f32 nan, %v602_v27 }
 0x13d   : > { %v2503_v43 = vpop.f32.mrb[0].mxu0 }
 0x13e   : > { %v2505_v44 = vpop.f32.mrb[1].mxu0  ;;  %v452_v45 = vmax.f32 %v2503_v43, 0.0  ;;  %v707_v28 = vadd.f32 %v2503_v43, %v693_v24  ;;  %v1957_v29 = vadd.f32 %v2503_v43, %v597_v22  ;;  %v1651_v22 = vld [vmem:[%s2702_s2 + $0x40] sm:$0xff] }
 0x13f   : > { %v451_v46 = vmax.f32 %v2505_v44, 0.0  ;;  %v706_v31 = vadd.f32 %v688_v25, %v2505_v44  ;;  %v1959_v32 = vadd.f32 %v592_v23, %v2505_v44 }
 0x141   : > { %v2509_v47 = vpop.f32.mrb[2].mxu0  ;;  %v1889_v48 = vpack.c.bf16 %v452_v45, %v451_v46 }
 0x142   : > { %v454_v49 = vmax.f32 %v2509_v47, 0.0  ;;  %v2512_v50 = vpop.f32.mrb[3].mxu0  ;;  %v709_v40 = vadd.f32 %v2509_v47, %v703_v30  ;;  %v1961_v41 = vadd.f32 %v2509_v47, %v607_v26 }
 0x143   : > { %v453_v51 = vmax.f32 %v2512_v50, 0.0  ;;  %1890 = vmatprep.subr.bf16.mxu1 %v1889_v48  ;;  %v708_v43 = vadd.f32 %v698_v33, %v2512_v50  ;;  %v1963_v45 = vadd.f32 %v602_v27, %v2512_v50  ;;  %v1624_v50 = vld [vmem:[%s2702_s2 + $0x28] sm:$0xff] }
 0x144   : > { %1892 = vmatpush3.bf16.msra.mxu1 %v1889_v48 }
 0x145   : > { %v1893_v52 = vpack.c.bf16 %v454_v49, %v453_v51 }
 0x147   : > { %1894 = vmatprep.subr.bf16.mxu1 %v1893_v52 }
 0x148   : > { %1896 = vmatpush3.bf16.msra.mxu1 %v1893_v52 }
 0x14b   : > { %1774 = vmatmul.mubr.msk.f32.vlgmr.msra.gmra.mrb[0].mxu1 %vm479_vm1, %v448_v53 }
 0x14c   : > { %1776 = vmatprep.mubr.msk.f32.mxu1 %vm479_vm1, %v449_v54 }
 0x14f   : > { %1777 = vmatmul.mubr.msk.f32.gmra.mrb[2].mxu1 %vm479_vm1, %v450_v55 }
 0x150   : > { %1787 = vmatprep.mubr.msk.f32.mxu1 %vm479_vm1, %v577_v56 }
 0x21e   : > { %v1775_v60 = vpop.f32.mrb[0].mxu1 }
 0x21f   : > { %v564_v61 = vadd.f32 %v1775_v60, %v467_v59  ;;  %v558_v62 = vpop.f32.mrb[1].mxu1  ;;  %v948_v59 = vld [vmem:[#allocation6 + $0x20] sm:$0xff]  ;;  %v838_v60 = vpop.permute.xlu1 %837 }
 0x220   : > { %v559_v63 = vadd.f32 %v558_v62, %v462_v57  ;;  %v1625_v57 = vld [vmem:[%s2702_s2 + $0x30] sm:$0xff] }
 0x221   : > { %v582_v0 = vmax.f32 %v564_v61, 0.0  ;;  %v833_v61 = vpop.permute.xlu0 %832 }
 0x222   : > { %v581_v2 = vmax.f32 %v559_v63, 0.0  ;;  %v1778_v3 = vpop.f32.mrb[2].mxu1 }
 0x223   : > { %v574_v4 = vadd.f32 %v1778_v3, %v477_v1  ;;  %v568_v6 = vpop.f32.mrb[3].mxu1  ;;  %v848_v3 = vpop.permute.xlu1 %847 }
 0x224   : > { %v1897_v7 = vpack.c.bf16 %v582_v0, %v581_v2  ;;  %v569_v9 = vadd.f32 %v568_v6, %v472_v58  ;;  %v1626_v58 = vld [vmem:[%s2702_s2 + $0x38] sm:$0xff] }
 0x225   : > { %v584_v10 = vmax.f32 %v574_v4, 0.0 }
 0x226   : > { %v583_v11 = vmax.f32 %v569_v9, 0.0  ;;  %1898 = vmatprep.subr.bf16.mxu1 %v1897_v7 }
 0x227   : > { %1900 = vmatpush3.bf16.msra.mxu1 %v1897_v7  ;;  %v843_v7 = vpop.permute.xlu0 %842  ;;  %v969_v23 = vpop.permute.xlu1 %968 }
 0x228   : > { %v1901_v13 = vpack.c.bf16 %v584_v10, %v583_v11 }
 0x22a   : > { %1902 = vmatprep.subr.bf16.mxu1 %v1901_v13 }
 0x22b   : > { %1904 = vmatpush3.bf16.msra.mxu1 %v1901_v13  ;;  %v964_v24 = vpop.permute.xlu0 %963 }
 0x22c   : > { %1906 = vmatprep.subr.bf16.mxu1 %v2387_v5 }
 0x22e   : > { %1788 = vmatmul.mubr.msk.f32.vlgmr.msra.gmra.mrb[4].mxu1 %vm479_vm1, %v578_v14 }
 0x22f   : > { %1908 = vmatpush3.bf16.msra.mxu1 %v2387_v5  ;;  %1790 = vmatprep.mubr.msk.f32.mxu1 %vm479_vm1, %v579_v15 }
 0x230   : > { %1910 = vmatprep.subr.bf16.mxu1 %v2392_v8 }
 0x232   : > { %1791 = vmatmul.mubr.msk.f32.gmra.mrb[6].mxu1 %vm479_vm1, %v580_v16 }
 0x233   : > { %1912 = vmatpush3.bf16.msra.mxu1 %v2392_v8  ;;  %1803 = vmatprep.mubr.msk.f32.mxu1 %vm349_vm0, %v1615_v17  ;;  %v949_v17 = vld [vmem:[#allocation6 + $0x28] sm:$0xff] }
 0x234   : > { %1801 = vmatprep.subr.mxu1 %v2407_v12 }
 0x237   : > { %1802 = vmatpush3.msra.mxu1 %v2407_v12 }
 0x238   : > { %1804 = vmatmul.mubr.msk.f32.vlgmr.msra.gmra.mrb[4].mxu1 %vm349_vm0, %v1616_v18  ;;  %v950_v18 = vld [vmem:[#allocation6 + $0x30] sm:$0xff] }
 0x239   : > { %1806 = vmatprep.mubr.msk.f32.mxu1 %vm349_vm0, %v1617_v19  ;;  %v951_v19 = vld [vmem:[#allocation6 + $0x38] sm:$0xff] }
 0x23c   : > { %1807 = vmatmul.mubr.msk.f32.gmra.mrb[6].mxu1 %vm349_vm0, %v1618_v20  ;;  %v1643_v20 = vld [vmem:[%s2701_s1 + $0x40] sm:$0xff] }
 0x23d   : > { %1861 = vmatprep.mubr.msk.f32.mxu1 %vm479_vm1, %v1651_v22 }
 0x30b   : > { %v1805_v34 = vpop.f32.mrb[4].mxu1 }
 0x30c   : > { %v2561_v35 = vadd.f32 %v1805_v34, %v707_v28  ;;  %v1958_v36 = vadd.f32 %v1957_v29, %v1805_v34  ;;  %v793_v37 = vpop.f32.mrb[5].mxu1  ;;  %v979_v29 = vpop.permute.xlu1 %978 }
 0x30d   : > { %v2563_v38 = vadd.f32 %v793_v37, %v706_v31  ;;  %v1960_v39 = vadd.f32 %v1959_v32, %v793_v37  ;;  %v974_v31 = vpop.permute.xlu0 %973 }
 0x30e   : > { %v822_v42 = vmax.f32 %v1958_v36, 0.0 }
 0x30f   : > { %v821_v46 = vmax.f32 %v1960_v39, 0.0  ;;  %v1808_v44 = vpop.f32.mrb[6].mxu1  ;;  %v1967_v26 = vadd.f32 %v964_v24, %v2563_v38 }
 0x310   : > { %v2569_v48 = vadd.f32 %v1808_v44, %v709_v40  ;;  %v1962_v49 = vadd.f32 %v1961_v41, %v1808_v44  ;;  %v803_v51 = vpop.f32.mrb[7].mxu1  ;;  %v1654_v44 = vld [vmem:[%s2702_s2 + $0x58] sm:$0xff] }
 0x311   : > { %v2571_v52 = vadd.f32 %v803_v51, %v708_v43  ;;  %v1964_v53 = vadd.f32 %v1963_v45, %v803_v51  ;;  %v1913_v54 = vpack.c.bf16 %v822_v42, %v821_v46  ;;  %v1652_v45 = vld [vmem:[%s2702_s2 + $0x48] sm:$0xff]  ;;  %v1653_v46 = vld [vmem:[%s2702_s2 + $0x50] sm:$0xff]  ;;  %v1210_v51 = vpop.permute.xlu1 %1209 }
 0x312   : > { %v824_v55 = vmax.f32 %v1962_v49, 0.0  ;;  %v1969_v33 = vadd.f32 %v979_v29, %v2569_v48  ;;  %v1320_v48 = vld [vmem:[#allocation6 + $0x40] sm:$0xff]  ;;  %v1322_v49 = vld [vmem:[#allocation6 + $0x50] sm:$0xff] }
 0x313   : > { %v823_v56 = vmax.f32 %v1964_v53, 0.0  ;;  %1914 = vmatprep.subr.bf16.mxu0 %v1913_v54  ;;  %v1971_v37 = vadd.f32 %v974_v31, %v2571_v52  ;;  %v1205_v52 = vpop.permute.xlu0 %1204 }
 0x314   : > { %1916 = vmatpush3.bf16.msra.mxu0 %v1913_v54 }
 0x315   : > { %v1917_v47 = vpack.c.bf16 %v824_v55, %v823_v56 }
 0x317   : > { %1918 = vmatprep.subr.bf16.mxu0 %v1917_v47 }
 0x318   : > { %1920 = vmatpush3.bf16.msra.mxu0 %v1917_v47 }
 0x31b   : > { %1818 = vmatmul.mubr.msk.f32.vlgmr.msra.gmra.mrb[4].mxu0 %vm479_vm1, %v1624_v50  ;;  %v1220_v50 = vpop.permute.xlu1 %1219 }
 0x31c   : > { %1820 = vmatprep.mubr.msk.f32.mxu0 %vm479_vm1, %v1625_v57 }
 0x31f   : > { %1821 = vmatmul.mubr.msk.f32.gmra.mrb[6].mxu0 %vm479_vm1, %v1626_v58 }
 0x320   : > { %1831 = vmatprep.mubr.msk.f32.mxu0 %vm479_vm1, %v948_v59  ;;  %v1215_v59 = vpop.permute.xlu0 %1214 }
 0x3ee   : > { %v1819_v62 = vpop.f32.mrb[4].mxu0 }
 0x3ef   : > { %v934_v63 = vadd.f32 %v1819_v62, %v838_v60  ;;  %v928_v0 = vpop.f32.mrb[5].mxu0 }
 0x3f0   : > { %v929_v1 = vadd.f32 %v928_v0, %v833_v61 }
 0x3f1   : > { %v953_v2 = vmax.f32 %v934_v63, 0.0 }
 0x3f2   : > { %v952_v4 = vmax.f32 %v929_v1, 0.0  ;;  %v1822_v6 = vpop.f32.mrb[6].mxu0 }
 0x3f3   : > { %v944_v9 = vadd.f32 %v1822_v6, %v848_v3  ;;  %v938_v10 = vpop.f32.mrb[7].mxu0  ;;  %v1321_v3 = vld [vmem:[#allocation6 + $0x48] sm:$0xff]  ;;  %v1336_v6 = vpop.permute.xlu0 %1335 }
 0x3f4   : > { %v1921_v11 = vpack.c.bf16 %v953_v2, %v952_v4  ;;  %v939_v13 = vadd.f32 %v938_v10, %v843_v7  ;;  %v1323_v4 = vld [vmem:[#allocation6 + $0x58] sm:$0xff]  ;;  %v1341_v7 = vpop.permute.xlu1 %1340 }
 0x3f5   : > { %v955_v14 = vmax.f32 %v944_v9, 0.0 }
 0x3f6   : > { %v954_v15 = vmax.f32 %v939_v13, 0.0  ;;  %1922 = vmatprep.subr.bf16.mxu0 %v1921_v11 }
 0x3f7   : > { %1924 = vmatpush3.bf16.msra.mxu0 %v1921_v11  ;;  %v1346_v9 = vpop.permute.xlu0 %1345 }
 0x3f8   : > { %v1925_v16 = vpack.c.bf16 %v955_v14, %v954_v15  ;;  %v1351_v10 = vpop.permute.xlu1 %1350 }
 0x3fa   : > { %1926 = vmatprep.subr.bf16.mxu0 %v1925_v16 }
 0x3fb   : > { %1928 = vmatpush3.bf16.msra.mxu0 %v1925_v16 }
 0x3fc   : > { %1930 = vmatprep.subr.bf16.mxu0 %v2387_v5 }
 0x3fe   : > { %1832 = vmatmul.mubr.msk.f32.vlgmr.msra.gmra.mrb[8].mxu0 %vm479_vm1, %v949_v17 }
 0x3ff   : > { %1932 = vmatpush3.bf16.msra.mxu0 %v2387_v5  ;;  %1834 = vmatprep.mubr.msk.f32.mxu0 %vm479_vm1, %v950_v18  ;;  %v1644_v5 = vld [vmem:[%s2701_s1 + $0x48] sm:$0xff] }
 0x400   : > { %1934 = vmatprep.subr.bf16.mxu0 %v2392_v8 }
 0x402   : > { %1835 = vmatmul.mubr.msk.f32.gmra.mrb[10].mxu0 %vm479_vm1, %v951_v19 }
 0x403   : > { %1936 = vmatpush3.bf16.msra.mxu0 %v2392_v8  ;;  %1847 = vmatprep.mubr.msk.f32.mxu0 %vm349_vm0, %v1643_v20  ;;  %v1646_v8 = vld [vmem:[%s2701_s1 + $0x58] sm:$0xff]  ;;  %v1465_v20 = vpop.permute.xlu0 %1464 }
 0x404   : > { %1845 = vmatprep.subr.mxu0 %v2407_v12 }
 0x407   : > { %1846 = vmatpush3.msra.mxu0 %v2407_v12  ;;  %v1965_v12 = vadd.f32 %v969_v23, %v2561_v35  ;;  %v1470_v23 = vpop.permute.xlu1 %1469  ;;  %v1475_v31 = vpop.permute.xlu0 %1474 }
 0x408   : > { %1848 = vmatmul.mubr.msk.f32.vlgmr.msra.gmra.mrb[8].mxu0 %vm349_vm0, %v1644_v5 }
 0x409   : > { %1850 = vmatprep.mubr.msk.f32.mxu0 %vm349_vm0, %v1645_v21 }
 0x40c   : > { %1851 = vmatmul.mubr.msk.f32.gmra.mrb[10].mxu0 %vm349_vm0, %v1646_v8 }
 0x40d   : > { %1875 = vmatprep.mubr.msk.f32.mxu0 %vm479_vm1, %v1320_v48 }
 0x4db   : > { %v1849_v25 = vpop.f32.mrb[8].mxu0 }
 0x4dc   : > { %v2617_v27 = vadd.f32 %v1965_v12, %v1849_v25  ;;  %v1165_v28 = vpop.f32.mrb[9].mxu0 }
 0x4dd   : > { %v2619_v30 = vadd.f32 %v1967_v26, %v1165_v28 }
 0x4de   : > { %v1194_v32 = vmax.f32 %v2617_v27, 0.0 }
 0x4df   : > { %v1193_v34 = vmax.f32 %v2619_v30, 0.0  ;;  %v1852_v36 = vpop.f32.mrb[10].mxu0 }
 0x4e0   : > { %v2625_v35 = vadd.f32 %v1969_v33, %v1852_v36  ;;  %v1175_v39 = vpop.f32.mrb[11].mxu0 }
 0x4e1   : > { %v2627_v38 = vadd.f32 %v1971_v37, %v1175_v39  ;;  %v1937_v40 = vpack.c.bf16 %v1194_v32, %v1193_v34  ;;  %v1480_v34 = vpop.permute.xlu1 %1479  ;;  %v1501_v37 = vlaneseq }
 0x4e2   : > { %v1196_v41 = vmax.f32 %v2625_v35, 0.0 }
 0x4e3   : > { %v1195_v42 = vmax.f32 %v2627_v38, 0.0  ;;  %1938 = vmatprep.subr.bf16.mxu1 %v1937_v40  ;;  %v1502_v39 = vshrl.u32 %v1501_v37, 7 }
 0x4e4   : > { %1940 = vmatpush3.bf16.msra.mxu1 %v1937_v40 }
 0x4e5   : > { %v1941_v43 = vpack.c.bf16 %v1196_v41, %v1195_v42  ;;  %v1503_v41 = vsub.s32 0, %v1502_v39 }
 0x4e7   : > { %1942 = vmatprep.subr.bf16.mxu1 %v1941_v43 }
 0x4e8   : > { %1944 = vmatpush3.bf16.msra.mxu1 %v1941_v43  ;;  %v1499_v43 = vpop.permute.xlu0 %1498 }
 0x4eb   : > { %1862 = vmatmul.mubr.msk.f32.vlgmr.msra.gmra.mrb[8].mxu1 %vm479_vm1, %v1652_v45 }
 0x4ec   : > { %1864 = vmatprep.mubr.msk.f32.mxu1 %vm479_vm1, %v1653_v46  ;;  %v1504_v46 = vrot.slane %v1499_v43, %v1503_v41 }
 0x4ef   : > { %1865 = vmatmul.mubr.msk.f32.gmra.mrb[10].mxu1 %vm479_vm1, %v1654_v44 }
 0x4f0   : > { %1878 = vmatprep.mubr.msk.f32.mxu1 %vm479_vm1, %v1322_v49 }
 0x5be   : > { %v1863_v53 = vpop.f32.mrb[8].mxu1 }
 0x5bf   : > { %v1306_v54 = vadd.f32 %v1863_v53, %v1210_v51  ;;  %v1300_v55 = vpop.f32.mrb[9].mxu1 }
 0x5c0   : > { %v1301_v56 = vadd.f32 %v1300_v55, %v1205_v52 }
 0x5c1   : > { %v1325_v47 = vmax.f32 %v1306_v54, 0.0 }
 0x5c2   : > { %v1324_v57 = vmax.f32 %v1301_v56, 0.0  ;;  %v1866_v58 = vpop.f32.mrb[10].mxu1 }
 0x5c3   : > { %v1316_v60 = vadd.f32 %v1866_v58, %v1220_v50  ;;  %v1310_v61 = vpop.f32.mrb[11].mxu1 }
 0x5c4   : > { %v1945_v62 = vpack.c.bf16 %v1325_v47, %v1324_v57  ;;  %v1311_v63 = vadd.f32 %v1310_v61, %v1215_v59 }
 0x5c5   : > { %v1327_v0 = vmax.f32 %v1316_v60, 0.0 }
 0x5c6   : > { %v1326_v1 = vmax.f32 %v1311_v63, 0.0  ;;  %1946 = vmatprep.subr.bf16.mxu0 %v1945_v62  ;;  %1953 = vmatprep.subr.bf16.mxu1 %v1945_v62 }
 0x5c7   : > { %1948 = vmatpush3.bf16.msra.mxu0 %v1945_v62  ;;  %1955 = vmatpush3.bf16.msra.mxu1 %v1945_v62 }
 0x5c8   : > { %v1949_v2 = vpack.c.bf16 %v1327_v0, %v1326_v1 }
 0x5ca   : > { %1950 = vmatprep.subr.bf16.mxu0 %v1949_v2  ;;  %1954 = vmatprep.subr.bf16.mxu1 %v1949_v2 }
 0x5cb   : > { %1952 = vmatpush3.bf16.msra.mxu0 %v1949_v2  ;;  %1956 = vmatpush3.bf16.msra.mxu1 %v1949_v2 }
 0x5ce   : > { %1876 = vmatmul.mubr.msk.f32.vlgmr.msra.gmra.mrb[12].mxu0 %vm479_vm1, %v1321_v3  ;;  %1879 = vmatmul.mubr.msk.f32.vlgmr.msra.gmra.mrb[12].mxu1 %vm479_vm1, %v1323_v4 }
 0x6a1   : > { %v1877_v11 = vpop.f32.mrb[12].mxu0  ;;  %v1880_v13 = vpop.f32.mrb[12].mxu1 }
 0x6a2   : > { %v1437_v14 = vadd.f32 %v1877_v11, %v1341_v7  ;;  %v1447_v15 = vadd.f32 %v1880_v13, %v1351_v10  ;;  %v1431_v16 = vpop.f32.mrb[13].mxu0  ;;  %v1441_v17 = vpop.f32.mrb[13].mxu1 }
 0x6a3   : > { %v1432_v18 = vadd.f32 %v1431_v16, %v1336_v6  ;;  %v1442_v19 = vadd.f32 %v1441_v17, %v1346_v9 }
 0x6a4   : > { %v1451_v5 = vadd.f32 %v2617_v27, %v1437_v14  ;;  %v1453_v21 = vadd.f32 %v2625_v35, %v1447_v15 }
 0x6a5   : > { %v1450_v8 = vadd.f32 %v2619_v30, %v1432_v18  ;;  %v1452_v22 = vadd.f32 %v2627_v38, %v1442_v19 }
 0x6a6   : > { %v1455_v24 = vmax.f32 %v1451_v5, 0.0  ;;  %v1457_v28 = vmax.f32 %v1453_v21, 0.0 }
 0x6a7   : > { %v1454_v12 = vmax.f32 %v1450_v8, 0.0  ;;  %v1456_v25 = vmax.f32 %v1452_v22, 0.0 }
 0x6a8   : > { %v1483_v26 = vmul.f32 %v1470_v23, %v1455_v24  ;;  %v1485_v27 = vmul.f32 %v1480_v34, %v1457_v28 }
 0x6a9   : > { %v1482_v29 = vmul.f32 %v1465_v20, %v1454_v12  ;;  %v1484_v33 = vmul.f32 %v1475_v31, %v1456_v25 }
 0x6ab   : > { %v1486_v32 = vadd.f32 %v1483_v26, %v1482_v29 }
 0x6ad   : > { %v1487_v36 = vadd.f32 %v1486_v32, %v1484_v33 }
 0x6af   : > { %v1488_v35 = vadd.f32 %v1487_v36, %v1485_v27 }
 0x6b1   : > { %v1489_v30 = vrot.slane %v1488_v35, 4 }
 0x6b3   : > { %v1490_v38 = vadd.f32 %v1489_v30, %v1488_v35 }
 0x6b5   : > { %v1491_v40 = vrot.slane %v1490_v38, 2 }
 0x6b7   : > { %v1492_v42 = vadd.f32 %v1491_v40, %v1490_v38 }
 0x6b9   : > { %v1493_v45 = vrot.slane %v1492_v42, 1 }
 0x6bb   : > { %v1494_v44 = vadd.f32 %v1493_v45, %v1492_v42 }
 0x6bd   : > { %v1505_v48 = vadd.f32 %v1504_v46, %v1494_v44 }
 0x6bf   : > { %1506 = vst [vmem:[%s339_s28] sm:$0x1] %v1505_v48 }
 0x6c0   : > { %2117 = shalt.err (!%p2114_p7)
}
 0x6c1   : > { %s2118_s25 = scalar_lea.hbm %s2656_s16, 16  ;;  %s2122_s21 = scalar_lea.hbm %s2708_s8, 32 }
 0x6c2   : > { %p2119_p9 = scmp.ne.s32.totalorder %s2656_s16, %s2118_s25  ;;  %p2123_p5 = scmp.lt.u32.totalorder %s2656_s16, %s2708_s8 }
 0x6c3   : > { %p2124_p2 = scmp.lt.u32.totalorder %s2122_s21, %s2118_s25  ;;  %p2126_p4 = scmp.lt.u32.totalorder %s2118_s25, %s2656_s16 }
 0x6c4   : > { %p2120_p1 = pnand %p2119_p9, %p2324_p12 }
 0x6c5   : > { %p2125_p13 = por %p2124_p2, %p2123_p5 }
 0x6c6   : > { %p2121_p0 = pneg %p2120_p1 }
 0x6c7   : > { %p2127_p6 = por %p2126_p4, %p2125_p13 }
 0x6c9   : > { %p2128_p8 = pnand %p2127_p6, %p2121_p0 }
 0x6cb   : > { %2131 = shalt.err (!%p2128_p8)
}
 0x6cc   : > { %1990 = dma.vmem_to_hbm [thread:$0]  (%p2324_p12), %s2658_s4, 16, %s2656_s16, %s1508_s20  }
 0x6cd PF: > { %s1532_s28 = sand.u32 1, %s2162_s29   ;;  %p2729_p10 = scmp.ne.s32.totalorder %s2716_s13, 0 }
 0x6ce   : > { %p2730_p11 = scmp.ge.s32.totalorder %s2174_s10, 2  ;;  %s1533_s11 = scalar_lea.sflag [#allocation5], %s1532_s28 }
 0x6d0   : > { %p2001_p3 = pnand %p2730_p11, %p2729_p10 }
 0x6d2   : > { %2157 = dma.done.wait (!%p2001_p3), %s1533_s11, 16  }
 0x6d3   : > { %2159 = vsyncadd (!%p2001_p3), %s1533_s11, 4294967280  ;;  %p24_p7 = scmp.ge.s32.totalorder %s2286_s18, 4   ;;  %s2731_s29 = smov %s2166_s30 }
 0x6d4   : > { %s2732_s30 = smov %s2170_s9  ;;  %s2733_s9 = smov %s2320_s23 }
 0x6d5   : > { %s2734_s10 = smov %s2286_s18  ;;  %26 = sbr.rel (!%p24_p7) target bundleno = 9 (0x9), region = 111 }
 0x6dc   :  { %1537 = vsyncpa [#allocation4], 1 }
 0x6dd   :  { %1539 = vsyncpa [#allocation4 + $0x1], 1 }
 0x6de   :  { %1540 = vsyncpa [#allocation7], 1 }
 0x6df   :  { %1541 = vsyncpa [#allocation5], 1 }
 0x6e0   :  { %1543 = vsyncpa [#allocation5 + $0x1], 1 }

// kernel: tpu_custom_call.1
= control target key start
LH: loop header
LB: loop body
LE: loop exit
PB: predicated region body
PF: predicated region fallthrough
CT: control target
= control target key end

     0   :  { %s2700_s0 = inlined_call_operand.hbm [shape: f32[2,40,128], index: 0, kind: input, shape index: {}]   ;;  %s2701_s1 = inlined_call_operand.vmem [shape: f32[3,32,40], index: 1, kind: input, shape index: {}]   ;;  %s2702_s2 = inlined_call_operand.vmem [shape: f32[3,32,32], index: 2, kind: input, shape index: {}]   ;;  %s2703_s3 = inlined_call_operand.vmem [shape: f32[3,32,1], index: 3, kind: input, shape index: {}]   ;;  %s2704_s4 = inlined_call_operand.hbm [shape: f32[3,32,32], index: 4, kind: input, shape index: {}]   ;;  %s2705_s5 = inlined_call_operand.vmem [shape: f32[3,32,1], index: 5, kind: input, shape index: {}]   ;;  %s2706_s6 = inlined_call_operand.vmem [shape: f32[32,1], index: 6, kind: input, shape index: {}]   ;;  %s2707_s7 = inlined_call_operand.<no memory space> [shape: f32[1,1], index: 7, kind: input, shape index: {}]   ;;  %s2708_s8 = inlined_call_operand.hbm [shape: f32[1,256], index: 8, kind: output, shape index: {}]  }
   0x1   :  { %2714 = sst [smem:[#allocation12_spill]] %s2704_s4  ;;  %v13_v0 = vstv %s2707_s7 }
   0x2   :  { %14 = vst [vmem:[#allocation2] sm:$0x1] %v13_v0 }
   0x3   :  { %15 = vsyncpa [#allocation4], 0 }
   0x4   :  { %17 = vsyncpa [#allocation4 + $0x1], 0 }
   0x5   :  { %18 = vsyncpa [#allocation7], 0 }
   0x6   :  { %19 = vsyncpa [#allocation5], 0 }
   0x7   :  { %21 = vsyncpa [#allocation5 + $0x1], 0  ;;  %s2230_s29 = smov 0   ;;  %s2232_s30 = smov 0  }
   0x8   :  { %s2234_s9 = smov 0   ;;  %s2236_s10 = smov 0  }
   0x9 LB: > { %s2251_s7 = sadd.s32 4294967295, %s2174_s10   ;;  %s1596_s11 = sadd.s32 4294967294, %s2174_s10   ;;  %s2174_s10 = sphi %s2236_s10, %s2734_s10   ;;  %s2170_s9 = sphi %s2234_s9, %s2733_s9   ;;  %s2166_s30 = sphi %s2232_s30, %s2732_s30   ;;  %s2162_s29 = sphi %s2230_s29, %s2731_s29  }
   0xa   : > { %p47_p0 = scmp.ne.s32.totalorder %s2166_s30, %s2162_s29  ;;  %p2709_p1 = scmp.eq.s32.totalorder %s2251_s7, 0 }
   0xb   : > { %p224_p3 = scmp.eq.s32.totalorder %s1596_s11, 1  ;;  %p1597_p5 = scmp.ge.s32.totalorder %s2174_s10, 1 }
   0xc   : > { %p2260_p4 = por %p2709_p1, %p47_p0  ;;  %p231_p7 = scmp.lt.s32.totalorder %s2174_s10, 3 }
   0xd   : > { %p2265_p6 = por %p224_p3, %p47_p0  ;;  %s2176_s15 = smov [#allocation6]  }
   0xe   : > { %s2715_s12 = scalar_select %p2260_p4, 1, 0 }
   0xf   : > { %s2716_s13 = scalar_select %p2265_p6, 1, 0 }
  0x10   : > { %p2270_p8 = pnand %p1597_p5, %p231_p7  ;;  %s252_s16 = sshll.u32 %s2176_s15, 4  ;;  %s2274_s16 = int_to_ptr.vmem [resolvable:$true] %s252_s16 }
  0x11   : > { %s2286_s18 = sadd.s32 1, %s2174_s10   ;;  %s34_s19 = sadd.s32 1, %s2170_s9 }
  0x12   : > { %s2717_s14 = scalar_select %p2270_p8, 1, 0 }
  0x13   : > { %p1992_p9 = pneg %p2270_p8  ;;  %s31_s20 = ssub.s32 %s2174_s10, %s2286_s18 }
  0x14   : > { %s2719_s4 = sld [smem:[#allocation12_spill]] }
  0x15   : > { %p2281_p11 = pnand %p1992_p9, %p2709_p1 }
  0x17   : > { %p2048_p13 = pneg %p2281_p11 }
  0x1a   : > { %s2046_s23 = scalar_lea.hbm %s2719_s4, 1536 }
  0x1b   : > { %p2047_p12 = scmp.ne.s32.totalorder %s2719_s4, %s2046_s23  ;;  %p2053_p5 = scmp.lt.u32.totalorder %s2046_s23, %s2719_s4 }
  0x1d   : > { %p2049_p0 = pnand %p2048_p13, %p2047_p12 }
  0x1f   : > { %p2050_p3 = pneg %p2049_p0 }
  0x21   : > { %p2055_p7 = pnand %p2053_p5, %p2050_p3 }
  0x23   : > { %2058 = shalt.err (!%p2055_p7)
}
  0x24   : > { %s2059_s28 = scalar_lea.vmem %s2274_s16, 1536  ;;  %p2067_p2 = scmp.lt.s32.totalorder %s2274_s16, %s2274_s16 }
  0x25   : > { %p2060_p9 = scmp.ne.s32.totalorder %s2274_s16, %s2059_s28  ;;  %p2068_p6 = scmp.lt.s32.totalorder %s2059_s28, %s2059_s28 }
  0x27   : > { %p2062_p10 = pnand %p2060_p9, %p2048_p13  ;;  %p2069_p4 = por %p2068_p6, %p2067_p2 }
  0x29   : > { %p2063_p1 = pneg %p2062_p10 }
  0x2b   : > { %p2070_p8 = pnand %p2069_p4, %p2063_p1 }
  0x2d   : > { %2073 = shalt.err (!%p2070_p8)
}
  0x2e   : > { %s2712_s11 = smov 128   ;;  %s2713_s15 = smov 8  }
  0x2f   : > { %1995 = dma.hbm_to_vmem [thread:$0]  (!%p2281_p11), %s2719_s4, 1536, %s2274_s16, [#allocation7], %s2712_s11, %s2712_s11, %s2713_s15  }
  0x30   : > { %p32_p1 = scmp.eq.s32.totalorder %s31_s20, 0  ;;  %p41_p2 = scmp.ne.s32.totalorder %s2170_s9, %s2166_s30 }
  0x31   : > { %p42_p4 = scmp.eq.s32.totalorder %s2174_s10, 0  ;;  %p2005_p6 = scmp.lt.s32.totalorder %s2174_s10, 2 }
  0x32   : > { %s2320_s23 = scalar_select %p32_p1, %s2170_s9, %s34_s19  }
  0x33   : > { %p43_p8 = por %p42_p4, %p41_p2  ;;  %p2720_p10 = scmp.eq.s32.totalorder %s2251_s7, 1 }
  0x34   : > { %s275_s17 = sand.u32 1, %s2170_s9   ;;  %s1982_s25 = smul.u32 640, %s2174_s10 }
  0x35   : > { %p2324_p12 = por %p2720_p10, %p41_p2  ;;  %s1981_s26 = smul.u32 40, %s275_s17 }
  0x36   : > { %p2330_p13 = pnand %p2005_p6, %p43_p8  ;;  %s2337_s19 = scalar_lea.hbm %s2700_s0, %s1982_s25 }
  0x37   : > { %s279_s28 = scalar_lea.vmem [#allocation3], %s1981_s26  ;;  %s2341_s22 = scalar_lea.sflag [#allocation4], %s275_s17 }
  0x38   : > { %s286_s21 = sshll.u32 %s279_s28, 4  ;;  %s2074_s11 = scalar_lea.hbm %s2337_s19, 640  ;;  %s2339_s21 = int_to_ptr.vmem [resolvable:$true] %s286_s21 }
  0x39   : > { %p2075_p11 = scmp.ne.s32.totalorder %s2337_s19, %s2074_s11  ;;  %p2076_p0 = pneg %p2330_p13 }
  0x3a   : > { %s2079_s20 = scalar_lea.hbm %s2700_s0, 1280  ;;  %p2080_p7 = scmp.lt.u32.totalorder %s2337_s19, %s2700_s0 }
  0x3b   : > { %p2077_p3 = pnand %p2076_p0, %p2075_p11  ;;  %p2081_p9 = scmp.lt.u32.totalorder %s2079_s20, %s2074_s11 }
  0x3c   : > { %p2083_p2 = scmp.lt.u32.totalorder %s2074_s11, %s2337_s19 }
  0x3d   : > { %p2078_p5 = pneg %p2077_p3  ;;  %p2082_p1 = por %p2081_p9, %p2080_p7 }
  0x3f   : > { %p2084_p4 = por %p2083_p2, %p2082_p1 }
  0x41   : > { %p2085_p6 = pnand %p2084_p4, %p2078_p5 }
  0x43   : > { %2088 = shalt.err (!%p2085_p6)
}
  0x44   : > { %s2089_s17 = scalar_lea.vmem %s2339_s21, 640  ;;  %s2179_s26 = smov [#allocation3]  }
  0x45   : > { %p2090_p8 = scmp.ne.s32.totalorder %s2339_s21, %s2089_s17  ;;  %s2094_s28 = sshll.u32 %s2179_s26, 4  ;;  %s2095_s28 = int_to_ptr.vmem [resolvable:$false] %s2094_s28 }
  0x46   : > { %s2096_s4 = scalar_lea.vmem %s2095_s28, 1280  ;;  %p2097_p3 = scmp.lt.s32.totalorder %s2339_s21, %s2095_s28 }
  0x47   : > { %p2092_p10 = pnand %p2090_p8, %p2076_p0  ;;  %p2098_p7 = scmp.lt.s32.totalorder %s2096_s4, %s2089_s17 }
  0x49   : > { %p2093_p11 = pneg %p2092_p10  ;;  %p2099_p9 = por %p2098_p7, %p2097_p3 }
  0x4b   : > { %p2100_p1 = pnand %p2099_p9, %p2093_p11 }
  0x4d   : > { %2103 = shalt.err (!%p2100_p1)
}
  0x4e   : > { %s2723_s11 = smov 8   ;;  %s2724_s15 = smov 128  }
  0x4f   : > { %1999 = dma.hbm_to_vmem [thread:$0]  (!%p2330_p13), %s2337_s19, 640, %s2339_s21, %s2341_s22, %s2724_s15, %s2724_s15, %s2723_s11  }
  0x50   : > { %p2725_p0 = scmp.ne.s32.totalorder %s2717_s14, 0 }
  0x51   : > { %s2375_s25 = sand.u32 (!%p2725_p0), 1, %s2166_s30   ;;  %p2726_p5 = scmp.ne.s32.totalorder (!%p2725_p0), %s2715_s12, 0 }
  0x52   : > { %298 = sbr.rel (%p2725_p0) target bundleno = 1741 (0x6cd), region = 52  ;;  %s301_s20 = scalar_lea.sflag (!%p2725_p0), [#allocation4], %s2375_s25 }
  0x53   : > { %s1983_s16 = smul.u32 (!%p2725_p0), 40, %s2375_s25 }
  0x55   : > { %s304_s17 = scalar_lea.vmem (!%p2725_p0), [#allocation3], %s1983_s16 }
  0x59   : > { %2149 = dma.done.wait (%p2726_p5), %s301_s20, 640  }
  0x5a   : > { %2151 = vsyncadd (%p2726_p5), %s301_s20, 4294966656  ;;  %p2727_p2 = scmp.eq.s32.totalorder %s2251_s7, 0 }
  0x5c   : > { %2153 = dma.done.wait (%p2727_p2), [#allocation7], 1536   ;;  %p2728_p13 = pmov %p2727_p2 }
  0x5d   : > { %v2180_v1 = vmov 0   ;;  %vm349_vm0 = vcmask 326656   ;;  %v340_v2 = vld [vmem:[%s304_s17] sm:$0xff]  ;;  %v341_v3 = vld [vmem:[%s304_s17 + $0x8] sm:$0xff]  ;;  %v342_v4 = vld [vmem:[%s304_s17 + $0x10] sm:$0xff]  ;;  %vm479_vm1 = vcmask 261120  }
  0x5e   : > { %2155 = vsyncadd (%p2728_p13), [#allocation7], 4294965760  ;;  %2045 = vset.pattern.permute.xlu1 %v2180_v1  ;;  %2044 = vset.pattern.permute.xlu0 %v2180_v1  ;;  %v2387_v5 = vpack.c.bf16 %v341_v3, %v340_v2  ;;  %v343_v6 = vld [vmem:[%s304_s17 + $0x18] sm:$0xff]  ;;  %v457_v9 = vld [vmem:[%s2703_s3 + $0x10] sm:$0xff]  ;;  %s1671_s26 = sshll.u32 %s2251_s7, 4  ;;  %s339_s28 = scalar_lea.vmem [#allocation8], %s2375_s25 }
  0x5f   : > { %v345_v7 = vld [vmem:[%s2701_s1] sm:$0xff]  ;;  %v2392_v8 = vpack.c.bf16 %v343_v6, %v342_v4  ;;  %471 = vperm.xlu1 %2045, %v457_v9   ;;  %v458_v11 = vld [vmem:[%s2703_s3 + $0x18] sm:$0xff]  ;;  %v456_v13 = vld [vmem:[%s2703_s3 + $0x8] sm:$0xff]  ;;  %s1520_s4 = sshll.u32 %s339_s28, 4  ;;  %s2656_s16 = scalar_lea.hbm %s2708_s8, %s1671_s26  ;;  %s2658_s4 = int_to_ptr.vmem [resolvable:$true] %s1520_s4 }
  0x60   : > { %1759 = vmatprep.mubr.msk.f32.mxu0 %vm349_vm0, %v345_v7  ;;  %1882 = vmatprep.subr.bf16.mxu0 %v2387_v5  ;;  %v455_v10 = vld [vmem:[%s2703_s3] sm:$0xff]  ;;  %v586_v14 = vld [vmem:[%s2705_s5 + $0x8] sm:$0xff]  ;;  %v347_v17 = vld [vmem:[%s2701_s1 + $0x10] sm:$0xff]  ;;  %s1508_s20 = scalar_lea.sflag [#allocation5], %s2375_s25  ;;  %s2104_s14 = scalar_lea.vmem %s2658_s4, 16 }
  0x61   : > { %1884 = vmatpush3.bf16.msra.mxu0 %v2387_v5  ;;  %461 = vperm.xlu0 %2044, %v455_v10   ;;  %v2407_v12 = vld [vmem:[%s304_s17 + $0x20] sm:$0xff]  ;;  %v588_v18 = vld [vmem:[%s2705_s5 + $0x18] sm:$0xff]  ;;  %v1495_v42 = vld [vmem:[#allocation2] sm:$0x1]  ;;  %p2105_p4 = scmp.ne.s32.totalorder %s2658_s4, %s2104_s14  ;;  %s2181_s7 = smov [#allocation8]  }
  0x62   : > { %1886 = vmatprep.subr.bf16.mxu0 %v2392_v8  ;;  %v346_v15 = vld [vmem:[%s2701_s1 + $0x8] sm:$0xff]  ;;  %v585_v16 = vld [vmem:[%s2705_s5] sm:$0xff]  ;;  %v348_v19 = vld [vmem:[%s2701_s1 + $0x18] sm:$0xff]  ;;  %s2108_s17 = sshll.u32 %s2181_s7, 4  ;;  %s2109_s17 = int_to_ptr.vmem [resolvable:$false] %s2108_s17 }
  0x63   : > { %476 = vperm.xlu1 %2045, %v458_v11   ;;  %v587_v20 = vld [vmem:[%s2705_s5 + $0x10] sm:$0xff]  ;;  %v447_v21 = vld [vmem:[%s2702_s2] sm:$0xff]  ;;  %v1628_v23 = vld [vmem:[%s2703_s3 + $0x28] sm:$0xff]  ;;  %p2106_p6 = pnand %p2105_p4, %p2324_p12  ;;  %s2110_s27 = scalar_lea.vmem %s2109_s17, 32 }
  0x64   : > { %1773 = vmatprep.mubr.msk.f32.mxu1 %vm479_vm1, %v447_v21  ;;  %v1627_v22 = vld [vmem:[%s2703_s3 + $0x20] sm:$0xff]  ;;  %v1629_v24 = vld [vmem:[%s2703_s3 + $0x30] sm:$0xff]  ;;  %v1630_v25 = vld [vmem:[%s2703_s3 + $0x38] sm:$0xff]  ;;  %p2111_p10 = scmp.lt.s32.totalorder %s2658_s4, %s2109_s17  ;;  %p2112_p11 = scmp.lt.s32.totalorder %s2110_s27, %s2104_s14 }
  0x65   : > { %1888 = vmatpush3.bf16.msra.mxu0 %v2392_v8  ;;  %466 = vperm.xlu0 %2044, %v456_v13   ;;  %v1635_v26 = vld [vmem:[%s2705_s5 + $0x20] sm:$0xff]  ;;  %v1636_v27 = vld [vmem:[%s2705_s5 + $0x28] sm:$0xff]  ;;  %v1637_v28 = vld [vmem:[%s2705_s5 + $0x30] sm:$0xff]  ;;  %p2107_p8 = pneg %p2106_p6 }
  0x66   : > { %1757 = vmatprep.subr.mxu0 %v2407_v12  ;;  %v1638_v29 = vld [vmem:[%s2705_s5 + $0x38] sm:$0xff]  ;;  %v1655_v30 = vld [vmem:[%s2703_s3 + $0x40] sm:$0xff]  ;;  %v1656_v31 = vld [vmem:[%s2703_s3 + $0x48] sm:$0xff]  ;;  %p2113_p3 = por %p2112_p11, %p2111_p10 }
  0x67   : > { %596 = vperm.xlu1 %2045, %v586_v14   ;;  %v1657_v32 = vld [vmem:[%s2703_s3 + $0x50] sm:$0xff]  ;;  %v1658_v33 = vld [vmem:[%s2703_s3 + $0x58] sm:$0xff]  ;;  %v1663_v34 = vld [vmem:[%s2705_s5 + $0x40] sm:$0xff] }
  0x68   : > { %v1664_v35 = vld [vmem:[%s2705_s5 + $0x48] sm:$0xff]  ;;  %v1665_v36 = vld [vmem:[%s2705_s5 + $0x50] sm:$0xff]  ;;  %v1666_v37 = vld [vmem:[%s2705_s5 + $0x58] sm:$0xff]  ;;  %p2114_p7 = pnand %p2113_p3, %p2107_p8 }
  0x69   : > { %1758 = vmatpush3.msra.mxu0 %v2407_v12  ;;  %591 = vperm.xlu0 %2044, %v585_v16   ;;  %v1458_v38 = vld [vmem:[%s2706_s6] sm:$0xff]  ;;  %v1459_v39 = vld [vmem:[%s2706_s6 + $0x8] sm:$0xff]  ;;  %v1460_v40 = vld [vmem:[%s2706_s6 + $0x10] sm:$0xff] }
  0x6a   : > { %1760 = vmatmul.mubr.msk.f32.vlgmr.msra.gmra.mrb[0].mxu0 %vm349_vm0, %v346_v15  ;;  %v1461_v41 = vld [vmem:[%s2706_s6 + $0x18] sm:$0xff]  ;;  %v448_v53 = vld [vmem:[%s2702_s2 + $0x8] sm:$0xff]  ;;  %v449_v54 = vld [vmem:[%s2702_s2 + $0x10] sm:$0xff] }
  0x6b   : > { %1762 = vmatprep.mubr.msk.f32.mxu0 %vm349_vm0, %v347_v17  ;;  %606 = vperm.xlu1 %2045, %v588_v18   ;;  %v450_v55 = vld [vmem:[%s2702_s2 + $0x18] sm:$0xff]  ;;  %v579_v15 = vld [vmem:[#allocation6 + $0x10] sm:$0xff]  ;;  %v580_v16 = vld [vmem:[#allocation6 + $0x18] sm:$0xff] }
  0x6c   : > { %v577_v56 = vld [vmem:[#allocation6] sm:$0xff]  ;;  %v578_v14 = vld [vmem:[#allocation6 + $0x8] sm:$0xff]  ;;  %v1616_v18 = vld [vmem:[%s2701_s1 + $0x28] sm:$0xff] }
  0x6d   : > { %601 = vperm.xlu0 %2044, %v587_v20   ;;  %v1615_v17 = vld [vmem:[%s2701_s1 + $0x20] sm:$0xff]  ;;  %v1618_v20 = vld [vmem:[%s2701_s1 + $0x38] sm:$0xff] }
  0x6e   : > { %1763 = vmatmul.mubr.msk.f32.gmra.mrb[2].mxu0 %vm349_vm0, %v348_v19  ;;  %v1617_v19 = vld [vmem:[%s2701_s1 + $0x30] sm:$0xff]  ;;  %v1623_v21 = vld [vmem:[%s2702_s2 + $0x20] sm:$0xff] }
  0x6f   : > { %837 = vperm.xlu1 %2045, %v1628_v23   ;;  %1817 = vmatprep.mubr.msk.f32.mxu0 %vm479_vm1, %v1623_v21  ;;  %v1645_v21 = vld [vmem:[%s2701_s1 + $0x50] sm:$0xff] }
  0x71   : > { %832 = vperm.xlu0 %2044, %v1627_v22  }
  0x73   : > { %847 = vperm.xlu1 %2045, %v1630_v25  }
  0x75   : > { %842 = vperm.xlu0 %2044, %v1629_v24  }
  0x77   : > { %968 = vperm.xlu1 %2045, %v1636_v27  }
  0x79   : > { %963 = vperm.xlu0 %2044, %v1635_v26  }
  0x7b   : > { %978 = vperm.xlu1 %2045, %v1638_v29  }
  0x7d   : > { %973 = vperm.xlu0 %2044, %v1637_v28  }
  0x7f   : > { %1209 = vperm.xlu1 %2045, %v1656_v31  }
  0x81   : > { %1204 = vperm.xlu0 %2044, %v1655_v30  }
  0x83   : > { %1219 = vperm.xlu1 %2045, %v1658_v33  }
  0x85   : > { %1214 = vperm.xlu0 %2044, %v1657_v32  }
  0x87   : > { %1340 = vperm.xlu1 %2045, %v1664_v35  }
  0x89   : > { %1335 = vperm.xlu0 %2044, %v1663_v34  }
  0x8b   : > { %1350 = vperm.xlu1 %2045, %v1666_v37  }
  0x8d   : > { %1345 = vperm.xlu0 %2044, %v1665_v36  }
  0x8f   : > { %1469 = vperm.xlu1 %2045, %v1459_v39  }
  0x91   : > { %1464 = vperm.xlu0 %2044, %v1458_v38  }
  0x93   : > { %1479 = vperm.xlu1 %2045, %v1461_v41  }
  0x95   : > { %1474 = vperm.xlu0 %2044, %v1460_v40  }
  0x99   : > { %1498 = vperm.xlu0 %2044, %v1495_v42  }
  0xde   : > { %v472_v58 = vpop.permute.xlu1 %471 }
  0xe0   : > { %v462_v57 = vpop.permute.xlu0 %461 }
  0xe2   : > { %v477_v1 = vpop.permute.xlu1 %476 }
  0xe4   : > { %v467_v59 = vpop.permute.xlu0 %466 }
  0xe6   : > { %v597_v22 = vpop.permute.xlu1 %596 }
  0xe7   : > { %v693_v24 = vadd.f32 nan, %v597_v22 }
  0xe8   : > { %v592_v23 = vpop.permute.xlu0 %591 }
  0xe9   : > { %v688_v25 = vadd.f32 nan, %v592_v23 }
  0xea   : > { %v607_v26 = vpop.permute.xlu1 %606 }
  0xeb   : > { %v703_v30 = vadd.f32 nan, %v607_v26 }
  0xec   : > { %v602_v27 = vpop.permute.xlu0 %601 }
  0xed   : > { %v698_v33 = vadd.f32 nan, %v602_v27 }
 0x13d   : > { %v2503_v43 = vpop.f32.mrb[0].mxu0 }
 0x13e   : > { %v2505_v44 = vpop.f32.mrb[1].mxu0  ;;  %v452_v45 = vmax.f32 %v2503_v43, 0.0  ;;  %v707_v28 = vadd.f32 %v2503_v43, %v693_v24  ;;  %v1957_v29 = vadd.f32 %v2503_v43, %v597_v22  ;;  %v1651_v22 = vld [vmem:[%s2702_s2 + $0x40] sm:$0xff] }
 0x13f   : > { %v451_v46 = vmax.f32 %v2505_v44, 0.0  ;;  %v706_v31 = vadd.f32 %v688_v25, %v2505_v44  ;;  %v1959_v32 = vadd.f32 %v592_v23, %v2505_v44 }
 0x141   : > { %v2509_v47 = vpop.f32.mrb[2].mxu0  ;;  %v1889_v48 = vpack.c.bf16 %v452_v45, %v451_v46 }
 0x142   : > { %v454_v49 = vmax.f32 %v2509_v47, 0.0  ;;  %v2512_v50 = vpop.f32.mrb[3].mxu0  ;;  %v709_v40 = vadd.f32 %v2509_v47, %v703_v30  ;;  %v1961_v41 = vadd.f32 %v2509_v47, %v607_v26 }
 0x143   : > { %v453_v51 = vmax.f32 %v2512_v50, 0.0  ;;  %1890 = vmatprep.subr.bf16.mxu1 %v1889_v48  ;;  %v708_v43 = vadd.f32 %v698_v33, %v2512_v50  ;;  %v1963_v45 = vadd.f32 %v602_v27, %v2512_v50  ;;  %v1624_v50 = vld [vmem:[%s2702_s2 + $0x28] sm:$0xff] }
 0x144   : > { %1892 = vmatpush3.bf16.msra.mxu1 %v1889_v48 }
 0x145   : > { %v1893_v52 = vpack.c.bf16 %v454_v49, %v453_v51 }
 0x147   : > { %1894 = vmatprep.subr.bf16.mxu1 %v1893_v52 }
 0x148   : > { %1896 = vmatpush3.bf16.msra.mxu1 %v1893_v52 }
 0x14b   : > { %1774 = vmatmul.mubr.msk.f32.vlgmr.msra.gmra.mrb[0].mxu1 %vm479_vm1, %v448_v53 }
 0x14c   : > { %1776 = vmatprep.mubr.msk.f32.mxu1 %vm479_vm1, %v449_v54 }
 0x14f   : > { %1777 = vmatmul.mubr.msk.f32.gmra.mrb[2].mxu1 %vm479_vm1, %v450_v55 }
 0x150   : > { %1787 = vmatprep.mubr.msk.f32.mxu1 %vm479_vm1, %v577_v56 }
 0x21e   : > { %v1775_v60 = vpop.f32.mrb[0].mxu1 }
 0x21f   : > { %v564_v61 = vadd.f32 %v1775_v60, %v467_v59  ;;  %v558_v62 = vpop.f32.mrb[1].mxu1  ;;  %v948_v59 = vld [vmem:[#allocation6 + $0x20] sm:$0xff]  ;;  %v838_v60 = vpop.permute.xlu1 %837 }
 0x220   : > { %v559_v63 = vadd.f32 %v558_v62, %v462_v57  ;;  %v1625_v57 = vld [vmem:[%s2702_s2 + $0x30] sm:$0xff] }
 0x221   : > { %v582_v0 = vmax.f32 %v564_v61, 0.0  ;;  %v833_v61 = vpop.permute.xlu0 %832 }
 0x222   : > { %v581_v2 = vmax.f32 %v559_v63, 0.0  ;;  %v1778_v3 = vpop.f32.mrb[2].mxu1 }
 0x223   : > { %v574_v4 = vadd.f32 %v1778_v3, %v477_v1  ;;  %v568_v6 = vpop.f32.mrb[3].mxu1  ;;  %v848_v3 = vpop.permute.xlu1 %847 }
 0x224   : > { %v1897_v7 = vpack.c.bf16 %v582_v0, %v581_v2  ;;  %v569_v9 = vadd.f32 %v568_v6, %v472_v58  ;;  %v1626_v58 = vld [vmem:[%s2702_s2 + $0x38] sm:$0xff] }
 0x225   : > { %v584_v10 = vmax.f32 %v574_v4, 0.0 }
 0x226   : > { %v583_v11 = vmax.f32 %v569_v9, 0.0  ;;  %1898 = vmatprep.subr.bf16.mxu1 %v1897_v7 }
 0x227   : > { %1900 = vmatpush3.bf16.msra.mxu1 %v1897_v7  ;;  %v843_v7 = vpop.permute.xlu0 %842  ;;  %v969_v23 = vpop.permute.xlu1 %968 }
 0x228   : > { %v1901_v13 = vpack.c.bf16 %v584_v10, %v583_v11 }
 0x22a   : > { %1902 = vmatprep.subr.bf16.mxu1 %v1901_v13 }
 0x22b   : > { %1904 = vmatpush3.bf16.msra.mxu1 %v1901_v13  ;;  %v964_v24 = vpop.permute.xlu0 %963 }
 0x22c   : > { %1906 = vmatprep.subr.bf16.mxu1 %v2387_v5 }
 0x22e   : > { %1788 = vmatmul.mubr.msk.f32.vlgmr.msra.gmra.mrb[4].mxu1 %vm479_vm1, %v578_v14 }
 0x22f   : > { %1908 = vmatpush3.bf16.msra.mxu1 %v2387_v5  ;;  %1790 = vmatprep.mubr.msk.f32.mxu1 %vm479_vm1, %v579_v15 }
 0x230   : > { %1910 = vmatprep.subr.bf16.mxu1 %v2392_v8 }
 0x232   : > { %1791 = vmatmul.mubr.msk.f32.gmra.mrb[6].mxu1 %vm479_vm1, %v580_v16 }
 0x233   : > { %1912 = vmatpush3.bf16.msra.mxu1 %v2392_v8  ;;  %1803 = vmatprep.mubr.msk.f32.mxu1 %vm349_vm0, %v1615_v17  ;;  %v949_v17 = vld [vmem:[#allocation6 + $0x28] sm:$0xff] }
 0x234   : > { %1801 = vmatprep.subr.mxu1 %v2407_v12 }
 0x237   : > { %1802 = vmatpush3.msra.mxu1 %v2407_v12 }
 0x238   : > { %1804 = vmatmul.mubr.msk.f32.vlgmr.msra.gmra.mrb[4].mxu1 %vm349_vm0, %v1616_v18  ;;  %v950_v18 = vld [vmem:[#allocation6 + $0x30] sm:$0xff] }
 0x239   : > { %1806 = vmatprep.mubr.msk.f32.mxu1 %vm349_vm0, %v1617_v19  ;;  %v951_v19 = vld [vmem:[#allocation6 + $0x38] sm:$0xff] }
 0x23c   : > { %1807 = vmatmul.mubr.msk.f32.gmra.mrb[6].mxu1 %vm349_vm0, %v1618_v20  ;;  %v1643_v20 = vld [vmem:[%s2701_s1 + $0x40] sm:$0xff] }
 0x23d   : > { %1861 = vmatprep.mubr.msk.f32.mxu1 %vm479_vm1, %v1651_v22 }
 0x30b   : > { %v1805_v34 = vpop.f32.mrb[4].mxu1 }
 0x30c   : > { %v2561_v35 = vadd.f32 %v1805_v34, %v707_v28  ;;  %v1958_v36 = vadd.f32 %v1957_v29, %v1805_v34  ;;  %v793_v37 = vpop.f32.mrb[5].mxu1  ;;  %v979_v29 = vpop.permute.xlu1 %978 }
 0x30d   : > { %v2563_v38 = vadd.f32 %v793_v37, %v706_v31  ;;  %v1960_v39 = vadd.f32 %v1959_v32, %v793_v37  ;;  %v974_v31 = vpop.permute.xlu0 %973 }
 0x30e   : > { %v822_v42 = vmax.f32 %v1958_v36, 0.0 }
 0x30f   : > { %v821_v46 = vmax.f32 %v1960_v39, 0.0  ;;  %v1808_v44 = vpop.f32.mrb[6].mxu1  ;;  %v1967_v26 = vadd.f32 %v964_v24, %v2563_v38 }
 0x310   : > { %v2569_v48 = vadd.f32 %v1808_v44, %v709_v40  ;;  %v1962_v49 = vadd.f32 %v1961_v41, %v1808_v44  ;;  %v803_v51 = vpop.f32.mrb[7].mxu1  ;;  %v1654_v44 = vld [vmem:[%s2702_s2 + $0x58] sm:$0xff] }
 0x311   : > { %v2571_v52 = vadd.f32 %v803_v51, %v708_v43  ;;  %v1964_v53 = vadd.f32 %v1963_v45, %v803_v51  ;;  %v1913_v54 = vpack.c.bf16 %v822_v42, %v821_v46  ;;  %v1652_v45 = vld [vmem:[%s2702_s2 + $0x48] sm:$0xff]  ;;  %v1653_v46 = vld [vmem:[%s2702_s2 + $0x50] sm:$0xff]  ;;  %v1210_v51 = vpop.permute.xlu1 %1209 }
 0x312   : > { %v824_v55 = vmax.f32 %v1962_v49, 0.0  ;;  %v1969_v33 = vadd.f32 %v979_v29, %v2569_v48  ;;  %v1320_v48 = vld [vmem:[#allocation6 + $0x40] sm:$0xff]  ;;  %v1322_v49 = vld [vmem:[#allocation6 + $0x50] sm:$0xff] }
 0x313   : > { %v823_v56 = vmax.f32 %v1964_v53, 0.0  ;;  %1914 = vmatprep.subr.bf16.mxu0 %v1913_v54  ;;  %v1971_v37 = vadd.f32 %v974_v31, %v2571_v52  ;;  %v1205_v52 = vpop.permute.xlu0 %1204 }
 0x314   : > { %1916 = vmatpush3.bf16.msra.mxu0 %v1913_v54 }
 0x315   : > { %v1917_v47 = vpack.c.bf16 %v824_v55, %v823_v56 }
 0x317   : > { %1918 = vmatprep.subr.bf16.mxu0 %v1917_v47 }
 0x318   : > { %1920 = vmatpush3.bf16.msra.mxu0 %v1917_v47 }
 0x31b   : > { %1818 = vmatmul.mubr.msk.f32.vlgmr.msra.gmra.mrb[4].mxu0 %vm479_vm1, %v1624_v50  ;;  %v1220_v50 = vpop.permute.xlu1 %1219 }
 0x31c   : > { %1820 = vmatprep.mubr.msk.f32.mxu0 %vm479_vm1, %v1625_v57 }
 0x31f   : > { %1821 = vmatmul.mubr.msk.f32.gmra.mrb[6].mxu0 %vm479_vm1, %v1626_v58 }
 0x320   : > { %1831 = vmatprep.mubr.msk.f32.mxu0 %vm479_vm1, %v948_v59  ;;  %v1215_v59 = vpop.permute.xlu0 %1214 }
 0x3ee   : > { %v1819_v62 = vpop.f32.mrb[4].mxu0 }
 0x3ef   : > { %v934_v63 = vadd.f32 %v1819_v62, %v838_v60  ;;  %v928_v0 = vpop.f32.mrb[5].mxu0 }
 0x3f0   : > { %v929_v1 = vadd.f32 %v928_v0, %v833_v61 }
 0x3f1   : > { %v953_v2 = vmax.f32 %v934_v63, 0.0 }
 0x3f2   : > { %v952_v4 = vmax.f32 %v929_v1, 0.0  ;;  %v1822_v6 = vpop.f32.mrb[6].mxu0 }
 0x3f3   : > { %v944_v9 = vadd.f32 %v1822_v6, %v848_v3  ;;  %v938_v10 = vpop.f32.mrb[7].mxu0  ;;  %v1321_v3 = vld [vmem:[#allocation6 + $0x48] sm:$0xff]  ;;  %v1336_v6 = vpop.permute.xlu0 %1335 }
 0x3f4   : > { %v1921_v11 = vpack.c.bf16 %v953_v2, %v952_v4  ;;  %v939_v13 = vadd.f32 %v938_v10, %v843_v7  ;;  %v1323_v4 = vld [vmem:[#allocation6 + $0x58] sm:$0xff]  ;;  %v1341_v7 = vpop.permute.xlu1 %1340 }
 0x3f5   : > { %v955_v14 = vmax.f32 %v944_v9, 0.0 }
 0x3f6   : > { %v954_v15 = vmax.f32 %v939_v13, 0.0  ;;  %1922 = vmatprep.subr.bf16.mxu0 %v1921_v11 }
 0x3f7   : > { %1924 = vmatpush3.bf16.msra.mxu0 %v1921_v11  ;;  %v1346_v9 = vpop.permute.xlu0 %1345 }
 0x3f8   : > { %v1925_v16 = vpack.c.bf16 %v955_v14, %v954_v15  ;;  %v1351_v10 = vpop.permute.xlu1 %1350 }
 0x3fa   : > { %1926 = vmatprep.subr.bf16.mxu0 %v1925_v16 }
 0x3fb   : > { %1928 = vmatpush3.bf16.msra.mxu0 %v1925_v16 }
 0x3fc   : > { %1930 = vmatprep.subr.bf16.mxu0 %v2387_v5 }
 0x3fe   : > { %1832 = vmatmul.mubr.msk.f32.vlgmr.msra.gmra.mrb[8].mxu0 %vm479_vm1, %v949_v17 }
 0x3ff   : > { %1932 = vmatpush3.bf16.msra.mxu0 %v2387_v5  ;;  %1834 = vmatprep.mubr.msk.f32.mxu0 %vm479_vm1, %v950_v18  ;;  %v1644_v5 = vld [vmem:[%s2701_s1 + $0x48] sm:$0xff] }
 0x400   : > { %1934 = vmatprep.subr.bf16.mxu0 %v2392_v8 }
 0x402   : > { %1835 = vmatmul.mubr.msk.f32.gmra.mrb[10].mxu0 %vm479_vm1, %v951_v19 }
 0x403   : > { %1936 = vmatpush3.bf16.msra.mxu0 %v2392_v8  ;;  %1847 = vmatprep.mubr.msk.f32.mxu0 %vm349_vm0, %v1643_v20  ;;  %v1646_v8 = vld [vmem:[%s2701_s1 + $0x58] sm:$0xff]  ;;  %v1465_v20 = vpop.permute.xlu0 %1464 }
 0x404   : > { %1845 = vmatprep.subr.mxu0 %v2407_v12 }
 0x407   : > { %1846 = vmatpush3.msra.mxu0 %v2407_v12  ;;  %v1965_v12 = vadd.f32 %v969_v23, %v2561_v35  ;;  %v1470_v23 = vpop.permute.xlu1 %1469  ;;  %v1475_v31 = vpop.permute.xlu0 %1474 }
 0x408   : > { %1848 = vmatmul.mubr.msk.f32.vlgmr.msra.gmra.mrb[8].mxu0 %vm349_vm0, %v1644_v5 }
 0x409   : > { %1850 = vmatprep.mubr.msk.f32.mxu0 %vm349_vm0, %v1645_v21 }
 0x40c   : > { %1851 = vmatmul.mubr.msk.f32.gmra.mrb[10].mxu0 %vm349_vm0, %v1646_v8 }
 0x40d   : > { %1875 = vmatprep.mubr.msk.f32.mxu0 %vm479_vm1, %v1320_v48 }
 0x4db   : > { %v1849_v25 = vpop.f32.mrb[8].mxu0 }
 0x4dc   : > { %v2617_v27 = vadd.f32 %v1965_v12, %v1849_v25  ;;  %v1165_v28 = vpop.f32.mrb[9].mxu0 }
 0x4dd   : > { %v2619_v30 = vadd.f32 %v1967_v26, %v1165_v28 }
 0x4de   : > { %v1194_v32 = vmax.f32 %v2617_v27, 0.0 }
 0x4df   : > { %v1193_v34 = vmax.f32 %v2619_v30, 0.0  ;;  %v1852_v36 = vpop.f32.mrb[10].mxu0 }
 0x4e0   : > { %v2625_v35 = vadd.f32 %v1969_v33, %v1852_v36  ;;  %v1175_v39 = vpop.f32.mrb[11].mxu0 }
 0x4e1   : > { %v2627_v38 = vadd.f32 %v1971_v37, %v1175_v39  ;;  %v1937_v40 = vpack.c.bf16 %v1194_v32, %v1193_v34  ;;  %v1480_v34 = vpop.permute.xlu1 %1479  ;;  %v1501_v37 = vlaneseq }
 0x4e2   : > { %v1196_v41 = vmax.f32 %v2625_v35, 0.0 }
 0x4e3   : > { %v1195_v42 = vmax.f32 %v2627_v38, 0.0  ;;  %1938 = vmatprep.subr.bf16.mxu1 %v1937_v40  ;;  %v1502_v39 = vshrl.u32 %v1501_v37, 7 }
 0x4e4   : > { %1940 = vmatpush3.bf16.msra.mxu1 %v1937_v40 }
 0x4e5   : > { %v1941_v43 = vpack.c.bf16 %v1196_v41, %v1195_v42  ;;  %v1503_v41 = vsub.s32 0, %v1502_v39 }
 0x4e7   : > { %1942 = vmatprep.subr.bf16.mxu1 %v1941_v43 }
 0x4e8   : > { %1944 = vmatpush3.bf16.msra.mxu1 %v1941_v43  ;;  %v1499_v43 = vpop.permute.xlu0 %1498 }
 0x4eb   : > { %1862 = vmatmul.mubr.msk.f32.vlgmr.msra.gmra.mrb[8].mxu1 %vm479_vm1, %v1652_v45 }
 0x4ec   : > { %1864 = vmatprep.mubr.msk.f32.mxu1 %vm479_vm1, %v1653_v46  ;;  %v1504_v46 = vrot.slane %v1499_v43, %v1503_v41 }
 0x4ef   : > { %1865 = vmatmul.mubr.msk.f32.gmra.mrb[10].mxu1 %vm479_vm1, %v1654_v44 }
 0x4f0   : > { %1878 = vmatprep.mubr.msk.f32.mxu1 %vm479_vm1, %v1322_v49 }
 0x5be   : > { %v1863_v53 = vpop.f32.mrb[8].mxu1 }
 0x5bf   : > { %v1306_v54 = vadd.f32 %v1863_v53, %v1210_v51  ;;  %v1300_v55 = vpop.f32.mrb[9].mxu1 }
 0x5c0   : > { %v1301_v56 = vadd.f32 %v1300_v55, %v1205_v52 }
 0x5c1   : > { %v1325_v47 = vmax.f32 %v1306_v54, 0.0 }
 0x5c2   : > { %v1324_v57 = vmax.f32 %v1301_v56, 0.0  ;;  %v1866_v58 = vpop.f32.mrb[10].mxu1 }
 0x5c3   : > { %v1316_v60 = vadd.f32 %v1866_v58, %v1220_v50  ;;  %v1310_v61 = vpop.f32.mrb[11].mxu1 }
 0x5c4   : > { %v1945_v62 = vpack.c.bf16 %v1325_v47, %v1324_v57  ;;  %v1311_v63 = vadd.f32 %v1310_v61, %v1215_v59 }
 0x5c5   : > { %v1327_v0 = vmax.f32 %v1316_v60, 0.0 }
 0x5c6   : > { %v1326_v1 = vmax.f32 %v1311_v63, 0.0  ;;  %1946 = vmatprep.subr.bf16.mxu0 %v1945_v62  ;;  %1953 = vmatprep.subr.bf16.mxu1 %v1945_v62 }
 0x5c7   : > { %1948 = vmatpush3.bf16.msra.mxu0 %v1945_v62  ;;  %1955 = vmatpush3.bf16.msra.mxu1 %v1945_v62 }
 0x5c8   : > { %v1949_v2 = vpack.c.bf16 %v1327_v0, %v1326_v1 }
 0x5ca   : > { %1950 = vmatprep.subr.bf16.mxu0 %v1949_v2  ;;  %1954 = vmatprep.subr.bf16.mxu1 %v1949_v2 }
 0x5cb   : > { %1952 = vmatpush3.bf16.msra.mxu0 %v1949_v2  ;;  %1956 = vmatpush3.bf16.msra.mxu1 %v1949_v2 }
 0x5ce   : > { %1876 = vmatmul.mubr.msk.f32.vlgmr.msra.gmra.mrb[12].mxu0 %vm479_vm1, %v1321_v3  ;;  %1879 = vmatmul.mubr.msk.f32.vlgmr.msra.gmra.mrb[12].mxu1 %vm479_vm1, %v1323_v4 }
 0x6a1   : > { %v1877_v11 = vpop.f32.mrb[12].mxu0  ;;  %v1880_v13 = vpop.f32.mrb[12].mxu1 }
 0x6a2   : > { %v1437_v14 = vadd.f32 %v1877_v11, %v1341_v7  ;;  %v1447_v15 = vadd.f32 %v1880_v13, %v1351_v10  ;;  %v1431_v16 = vpop.f32.mrb[13].mxu0  ;;  %v1441_v17 = vpop.f32.mrb[13].mxu1 }
 0x6a3   : > { %v1432_v18 = vadd.f32 %v1431_v16, %v1336_v6  ;;  %v1442_v19 = vadd.f32 %v1441_v17, %v1346_v9 }
 0x6a4   : > { %v1451_v5 = vadd.f32 %v2617_v27, %v1437_v14  ;;  %v1453_v21 = vadd.f32 %v2625_v35, %v1447_v15 }
 0x6a5   : > { %v1450_v8 = vadd.f32 %v2619_v30, %v1432_v18  ;;  %v1452_v22 = vadd.f32 %v2627_v38, %v1442_v19 }
 0x6a6   : > { %v1455_v24 = vmax.f32 %v1451_v5, 0.0  ;;  %v1457_v28 = vmax.f32 %v1453_v21, 0.0 }
 0x6a7   : > { %v1454_v12 = vmax.f32 %v1450_v8, 0.0  ;;  %v1456_v25 = vmax.f32 %v1452_v22, 0.0 }
 0x6a8   : > { %v1483_v26 = vmul.f32 %v1470_v23, %v1455_v24  ;;  %v1485_v27 = vmul.f32 %v1480_v34, %v1457_v28 }
 0x6a9   : > { %v1482_v29 = vmul.f32 %v1465_v20, %v1454_v12  ;;  %v1484_v33 = vmul.f32 %v1475_v31, %v1456_v25 }
 0x6ab   : > { %v1486_v32 = vadd.f32 %v1483_v26, %v1482_v29 }
 0x6ad   : > { %v1487_v36 = vadd.f32 %v1486_v32, %v1484_v33 }
 0x6af   : > { %v1488_v35 = vadd.f32 %v1487_v36, %v1485_v27 }
 0x6b1   : > { %v1489_v30 = vrot.slane %v1488_v35, 4 }
 0x6b3   : > { %v1490_v38 = vadd.f32 %v1489_v30, %v1488_v35 }
 0x6b5   : > { %v1491_v40 = vrot.slane %v1490_v38, 2 }
 0x6b7   : > { %v1492_v42 = vadd.f32 %v1491_v40, %v1490_v38 }
 0x6b9   : > { %v1493_v45 = vrot.slane %v1492_v42, 1 }
 0x6bb   : > { %v1494_v44 = vadd.f32 %v1493_v45, %v1492_v42 }
 0x6bd   : > { %v1505_v48 = vadd.f32 %v1504_v46, %v1494_v44 }
 0x6bf   : > { %1506 = vst [vmem:[%s339_s28] sm:$0x1] %v1505_v48 }
 0x6c0   : > { %2117 = shalt.err (!%p2114_p7)
}
 0x6c1   : > { %s2118_s25 = scalar_lea.hbm %s2656_s16, 16  ;;  %s2122_s21 = scalar_lea.hbm %s2708_s8, 32 }
 0x6c2   : > { %p2119_p9 = scmp.ne.s32.totalorder %s2656_s16, %s2118_s25  ;;  %p2123_p5 = scmp.lt.u32.totalorder %s2656_s16, %s2708_s8 }
 0x6c3   : > { %p2124_p2 = scmp.lt.u32.totalorder %s2122_s21, %s2118_s25  ;;  %p2126_p4 = scmp.lt.u32.totalorder %s2118_s25, %s2656_s16 }
 0x6c4   : > { %p2120_p1 = pnand %p2119_p9, %p2324_p12 }
 0x6c5   : > { %p2125_p13 = por %p2124_p2, %p2123_p5 }
 0x6c6   : > { %p2121_p0 = pneg %p2120_p1 }
 0x6c7   : > { %p2127_p6 = por %p2126_p4, %p2125_p13 }
 0x6c9   : > { %p2128_p8 = pnand %p2127_p6, %p2121_p0 }
 0x6cb   : > { %2131 = shalt.err (!%p2128_p8)
}
 0x6cc   : > { %1990 = dma.vmem_to_hbm [thread:$0]  (%p2324_p12), %s2658_s4, 16, %s2656_s16, %s1508_s20  }
 0x6cd PF: > { %s1532_s28 = sand.u32 1, %s2162_s29   ;;  %p2729_p10 = scmp.ne.s32.totalorder %s2716_s13, 0 }
 0x6ce   : > { %p2730_p11 = scmp.ge.s32.totalorder %s2174_s10, 2  ;;  %s1533_s11 = scalar_lea.sflag [#allocation5], %s1532_s28 }
 0x6d0   : > { %p2001_p3 = pnand %p2730_p11, %p2729_p10 }
 0x6d2   : > { %2157 = dma.done.wait (!%p2001_p3), %s1533_s11, 16  }
 0x6d3   : > { %2159 = vsyncadd (!%p2001_p3), %s1533_s11, 4294967280  ;;  %p24_p7 = scmp.ge.s32.totalorder %s2286_s18, 4   ;;  %s2731_s29 = smov %s2166_s30 }
 0x6d4   : > { %s2732_s30 = smov %s2170_s9  ;;  %s2733_s9 = smov %s2320_s23 }
 0x6d5   : > { %s2734_s10 = smov %s2286_s18  ;;  %26 = sbr.rel (!%p24_p7) target bundleno = 9 (0x9), region = 111 }
 0x6dc   :  { %1537 = vsyncpa [#allocation4], 1 }
 0x6dd   :  { %1539 = vsyncpa [#allocation4 + $0x1], 1 }
 0x6de   :  { %1540 = vsyncpa [#allocation7], 1 }
 0x6df   :  { %1541 = vsyncpa [#allocation5], 1 }
 0x6e0   :  { %1543 = vsyncpa [#allocation5 + $0x1], 1 }

</bundles_post_ra>
